<compile_context>
chip_gen: v6e
topology: v6e:2x2x1
jax: 0.10.0
libtpu: 0.0.40
codegen_flags: <defaults>
</compile_context>

<pallas_src>
import jax
import jax.numpy as jnp
import numpy as np
from jax.experimental import pallas as pl
from jax.experimental.pallas import tpu as pltpu

# Static model configuration (small shapes consistent with the PyTorch module).
B = 2        # batch
T = 8        # input sequence length
N = 16       # n_nodes
F = 4        # input_size
H = 32       # hidden_size
HOR = 4      # horizon
K = 2        # gnn_kernel (diffusion hops), rnn_layers = 1

BN = B * N
HP = jax.lax.Precision.HIGHEST   # glue / reference precision (not the kernel hot path)


def _time_then_space_kernel(x_ref,        # [T*B*N, F]   time-major input, rows ordered (t, b, n)
                            wxg_ref,      # [F, 3H]      W_enc @ [W_ir|W_iz|W_in]
                            big_ref,      # [B*N, 3H]    (b_enc + emb) @ W_ih + b_ih (+ b_hh for r,z)
                            whh_ref,      # [H, 3H]      [W_hr|W_hz|W_hn]
                            bhn_ref,      # [1, H]       b_hn (n-gate hidden bias, scaled by r)
                            pstk_ref,     # [2K*B*N, B*N] stacked block-diagonal hop matrices
                            wfd_ref,      # [(2K+1)*H, HOR*F]  DiffConv filters pre-composed w/ decoder
                            bfd_ref,      # [1, HOR*F]
                            out_ref):     # [B*N, HOR*F]
    f32 = jnp.float32

    # ---- encoder + node-embedding + input-side GRU gates, hoisted out of the recurrence ----
    gi_all = jnp.dot(x_ref[...], wxg_ref[...], preferred_element_type=f32)   # [T*BN, 3H]
    bi_g = big_ref[...]                                                      # [BN, 3H]
    whh = whh_ref[...]                                                       # [H, 3H]
    bhn = bhn_ref[...]                                                       # [1, H]

    # ---- GRU recurrence: a single fused [BN,H]x[H,3H] matmul per step ----
    h = jnp.zeros((BN, H), f32)
    for t in range(T):                       # static unroll; T is small
        gi = gi_all[t * BN:(t + 1) * BN, :] + bi_g                           # [BN, 3H]
        gh = jnp.dot(h, whh, preferred_element_type=f32)                     # [BN, 3H]
        rz = jax.nn.sigmoid(gi[:, :2 * H] + gh[:, :2 * H])                   # fused r|z activation
        r = rz[:, :H]
        z = rz[:, H:]
        n = jnp.tanh(gi[:, 2 * H:] + r * (gh[:, 2 * H:] + bhn))              # PyTorch GRU n-gate
        h = (1.0 - z) * n + z * h                                            # [BN, H]

    # ---- DiffConv: all 2K graph hops in ONE matmul (powers precomputed in glue) ----
    hops = jnp.dot(pstk_ref[...], h, preferred_element_type=f32)             # [2K*BN, H]

    # ---- fused DiffConv filter + decoder (weights pre-composed in glue) ----
    wfd = wfd_ref[...]                                                       # [(2K+1)*H, HOR*F]
    acc = jnp.dot(h, wfd[0:H, :], preferred_element_type=f32)                # hop 0 (identity)
    for i in range(2 * K):                   # independent tiny matmuls, no dependency chain
        acc = acc + jnp.dot(hops[i * BN:(i + 1) * BN, :],
                            wfd[(i + 1) * H:(i + 2) * H, :],
                            preferred_element_type=f32)
    out_ref[...] = acc + bfd_ref[...]                                        # single store


def _transition_matrices(edge_index, edge_weight):
    # DCRNN-style random-walk transitions (glue: scatter/normalization, not hot path).
    A = jnp.zeros((N, N), jnp.float32).at[edge_index[0], edge_index[1]].add(edge_weight)
    in_deg = A.sum(axis=0)
    out_deg = A.sum(axis=1)
    P_fwd = A.T / jnp.where(in_deg == 0, 1.0, in_deg)[:, None]
    P_bwd = A / jnp.where(out_deg == 0, 1.0, out_deg)[:, None]
    return P_fwd, P_bwd


def time_then_space_forward(x, edge_index, edge_weight, params):
    (W_enc, b_enc, emb, W_ih, W_hh, b_ih, b_hh, W_filt, b_filt, W_dec, b_dec) = params
    P_fwd, P_bwd = _transition_matrices(edge_index, edge_weight)

    # ---- glue: layout + trace-time weight pre-composition (off the hot path) ----
    x_flat = jnp.transpose(x, (1, 0, 2, 3)).reshape(T * BN, F)               # rows (t, b, n)
    W_ih_cat = jnp.concatenate([W_ih[0], W_ih[1], W_ih[2]], axis=1)          # [H, 3H]
    W_hh_cat = jnp.concatenate([W_hh[0], W_hh[1], W_hh[2]], axis=1)          # [H, 3H]
    b_ih_cat = jnp.concatenate([b_ih[0], b_ih[1], b_ih[2]], axis=1)          # [1, 3H]
    # encoder folded into the input-side gate weights:
    #   (x @ W_enc + b_enc + emb) @ W_ih + b_ih == x @ (W_enc @ W_ih) + ((b_enc + emb) @ W_ih + b_ih)
    W_x_gates = jnp.dot(W_enc, W_ih_cat, precision=HP)                       # [F, 3H]
    emb_tiled = jnp.tile(b_enc + emb, (B, 1))                                # [BN, H], rows (b, n)
    b_i_gates = jnp.dot(emb_tiled, W_ih_cat, precision=HP) + b_ih_cat        # [BN, 3H]
    # hidden-side biases of the r/z gates add directly to the pre-activation -> fold them in;
    # the n-gate hidden bias is multiplied by r, so it stays a separate kernel input.
    b_hh_rz = jnp.concatenate([b_hh[0], b_hh[1], jnp.zeros_like(b_hh[2])], axis=1)
    b_i_gates = b_i_gates + b_hh_rz                                          # [BN, 3H]
    b_h_n = b_hh[2]                                                          # [1, H]

    # DiffConv hop matrices: powers precomputed at trace time, block-diagonal over batch,
    # stacked vertically so all hops are one kernel matmul.
    eyeB = jnp.eye(B, dtype=jnp.float32)
    hop_mats = []
    Pk = P_fwd
    for _ in range(K):                                                       # P, P^2 (forward)
        hop_mats.append(Pk)
        Pk = jnp.dot(Pk, P_fwd, precision=HP)
    Pk = P_bwd
    for _ in range(K):                                                       # P, P^2 (backward)
        hop_mats.append(Pk)
        Pk = jnp.dot(Pk, P_bwd, precision=HP)
    P_stack = jnp.concatenate([jnp.kron(eyeB, Pi) for Pi in hop_mats], axis=0)  # [2K*BN, BN]

    # decoder folded into the DiffConv filter weights
    W_fd = jnp.concatenate([jnp.dot(W_filt[i], W_dec, precision=HP)
                            for i in range(2 * K + 1)], axis=0)              # [(2K+1)*H, HOR*F]
    b_fd = jnp.dot(b_filt, W_dec, precision=HP) + b_dec                      # [1, HOR*F]

    vmem = pl.BlockSpec(memory_space=pltpu.MemorySpace.VMEM)
    out = pl.pallas_call(
        _time_then_space_kernel,
        out_shape=jax.ShapeDtypeStruct((BN, HOR * F), jnp.float32),
        in_specs=[vmem] * 8,
        out_specs=vmem,
    )(x_flat, W_x_gates, b_i_gates, W_hh_cat, b_h_n, P_stack, W_fd, b_fd)

    # glue: rearrange 'b n (t f) -> b t n f'
    return out.reshape(B, N, HOR, F).transpose(0, 2, 1, 3)


def init_params(key):
    ks = jax.random.split(key, 11)
    W_enc = 0.2 * jax.random.normal(ks[0], (F, H), jnp.float32)
    b_enc = 0.1 * jax.random.normal(ks[1], (1, H), jnp.float32)
    emb = 0.2 * jax.random.normal(ks[2], (N, H), jnp.float32)          # NodeEmbedding
    W_ih = 0.2 * jax.random.normal(ks[3], (3, H, H), jnp.float32)      # GRU gates [r, z, n]
    W_hh = 0.2 * jax.random.normal(ks[4], (3, H, H), jnp.float32)
    b_ih = 0.1 * jax.random.normal(ks[5], (3, 1, H), jnp.float32)
    b_hh = 0.1 * jax.random.normal(ks[6], (3, 1, H), jnp.float32)
    W_filt = 0.2 * jax.random.normal(ks[7], (2 * K + 1, H, H), jnp.float32)  # DiffConv filters
    b_filt = 0.1 * jax.random.normal(ks[8], (1, H), jnp.float32)
    W_dec = 0.2 * jax.random.normal(ks[9], (H, F * HOR), jnp.float32)
    b_dec = 0.1 * jax.random.normal(ks[10], (1, F * HOR), jnp.float32)
    return (W_enc, b_enc, emb, W_ih, W_hh, b_ih, b_hh, W_filt, b_filt, W_dec, b_dec)


def reference_forward(x, edge_index, edge_weight, params):
    # Pure-JAX full-precision reference with the original [B, T, N, F] layout.
    (W_enc, b_enc, emb, W_ih, W_hh, b_ih, b_hh, W_filt, b_filt, W_dec, b_dec) = params
    P_fwd, P_bwd = _transition_matrices(edge_index, edge_weight)
    xe = jnp.einsum('btnf,fh->btnh', x, W_enc, precision=HP) + b_enc + emb
    h = jnp.zeros((B, N, H), jnp.float32)
    for t in range(T):
        xt = xe[:, t]
        gi_r = jnp.einsum('bnh,hk->bnk', xt, W_ih[0], precision=HP) + b_ih[0]
        gi_z = jnp.einsum('bnh,hk->bnk', xt, W_ih[1], precision=HP) + b_ih[1]
        gi_n = jnp.einsum('bnh,hk->bnk', xt, W_ih[2], precision=HP) + b_ih[2]
        gh_r = jnp.einsum('bnh,hk->bnk', h, W_hh[0], precision=HP) + b_hh[0]
        gh_z = jnp.einsum('bnh,hk->bnk', h, W_hh[1], precision=HP) + b_hh[1]
        gh_n = jnp.einsum('bnh,hk->bnk', h, W_hh[2], precision=HP) + b_hh[2]
        r = jax.nn.sigmoid(gi_r + gh_r)
        z = jax.nn.sigmoid(gi_z + gh_z)
        n = jnp.tanh(gi_n + r * gh_n)
        h = (1.0 - z) * n + z * h
    acc = jnp.einsum('bnh,hk->bnk', h, W_filt[0], precision=HP)
    xs = h
    for i in range(K):
        xs = jnp.einsum('nm,bmh->bnh', P_fwd, xs, precision=HP)
        acc = acc + jnp.einsum('bnh,hk->bnk', xs, W_filt[1 + i], precision=HP)
    xs = h
    for i in range(K):
        xs = jnp.einsum('nm,bmh->bnh', P_bwd, xs, precision=HP)
        acc = acc + jnp.einsum('bnh,hk->bnk', xs, W_filt[1 + K + i], precision=HP)
    zb = acc + b_filt
    dec = jnp.einsum('bnh,hk->bnk', zb, W_dec, precision=HP) + b_dec
    return dec.reshape(B, N, HOR, F).transpose(0, 2, 1, 3)


if __name__ == "__main__":
    key = jax.random.PRNGKey(0)
    k_x, k_w, k_p = jax.random.split(key, 3)
    x = jax.random.normal(k_x, (B, T, N, F), jnp.float32)
    src = jnp.arange(N, dtype=jnp.int32)
    edge_index = jnp.concatenate(
        [jnp.stack([src, (src + 1) % N]), jnp.stack([src, (src + 3) % N])], axis=1)  # [2, 32]
    edge_weight = 0.5 + jax.random.uniform(k_w, (edge_index.shape[1],), jnp.float32)
    params = init_params(k_p)

    out = time_then_space_forward(x, edge_index, edge_weight, params)
    out = jax.block_until_ready(out)

    ref = reference_forward(x, edge_index, edge_weight, params)
    assert out.shape == (B, HOR, N, F)
    err = float(np.max(np.abs(np.asarray(out) - np.asarray(ref))))
    # Tolerance reflects native (bf16-pass) MXU matmuls in the kernel vs. the
    # full-f32 (HIGHEST-precision) reference.
    assert np.allclose(np.asarray(out), np.asarray(ref), rtol=2e-2, atol=2e-2), err
    print("KERNEL_OK")
</pallas_src>

<mosaic_0001>
module attributes {stable_mosaic.version = 11 : i64} {
  func.func @_time_then_space_kernel(%arg0: memref<256x4xf32, #tpu.memory_space<vmem>>, %arg1: memref<4x96xf32, #tpu.memory_space<vmem>>, %arg2: memref<32x96xf32, #tpu.memory_space<vmem>>, %arg3: memref<32x96xf32, #tpu.memory_space<vmem>>, %arg4: memref<1x32xf32, #tpu.memory_space<vmem>>, %arg5: memref<128x32xf32, #tpu.memory_space<vmem>>, %arg6: memref<160x16xf32, #tpu.memory_space<vmem>>, %arg7: memref<1x16xf32, #tpu.memory_space<vmem>>, %arg8: memref<32x16xf32, #tpu.memory_space<vmem>>) attributes {dimension_semantics = [], scalar_prefetch = 0 : i64, scratch_operands = 0 : i64, tpu.core_type = #tpu.core_type<tc>} {
    %c0 = arith.constant 0 : index
    %c0_0 = arith.constant 0 : index
    %0 = vector.load %arg0[%c0, %c0_0] : memref<256x4xf32, #tpu.memory_space<vmem>>, vector<256x4xf32>
    %c0_1 = arith.constant 0 : index
    %c0_2 = arith.constant 0 : index
    %1 = vector.load %arg1[%c0_1, %c0_2] : memref<4x96xf32, #tpu.memory_space<vmem>>, vector<4x96xf32>
    %cst = arith.constant dense<0.000000e+00> : vector<256x96xf32>
    %2 = tpu.matmul %0, %1, %cst {dimension_numbers = #tpu.dot_dimension_numbers<[1], [0], [0], [1], [0, 0, 1, 1], [], []>} : vector<256x4xf32>, vector<4x96xf32>, vector<256x96xf32> -> vector<256x96xf32>
    %c0_3 = arith.constant 0 : index
    %c0_4 = arith.constant 0 : index
    %3 = vector.load %arg2[%c0_3, %c0_4] : memref<32x96xf32, #tpu.memory_space<vmem>>, vector<32x96xf32>
    %c0_5 = arith.constant 0 : index
    %c0_6 = arith.constant 0 : index
    %4 = vector.load %arg3[%c0_5, %c0_6] : memref<32x96xf32, #tpu.memory_space<vmem>>, vector<32x96xf32>
    %c0_7 = arith.constant 0 : index
    %c0_8 = arith.constant 0 : index
    %5 = vector.load %arg4[%c0_7, %c0_8] : memref<1x32xf32, #tpu.memory_space<vmem>>, vector<1x32xf32>
    %cst_9 = arith.constant 0.000000e+00 : f32
    %6 = vector.broadcast %cst_9 : f32 to vector<32x32xf32>
    %7 = vector.extract_strided_slice %2 {offsets = [0, 0], sizes = [32, 96], strides = [1, 1]} : vector<256x96xf32> to vector<32x96xf32>
    %8 = arith.addf %7, %3 : vector<32x96xf32>
    %cst_10 = arith.constant dense<0.000000e+00> : vector<32x96xf32>
    %9 = tpu.matmul %6, %4, %cst_10 {dimension_numbers = #tpu.dot_dimension_numbers<[1], [0], [0], [1], [0, 0, 1, 1], [], []>} : vector<32x32xf32>, vector<32x96xf32>, vector<32x96xf32> -> vector<32x96xf32>
    %10 = vector.extract_strided_slice %8 {offsets = [0, 0], sizes = [32, 64], strides = [1, 1]} : vector<32x96xf32> to vector<32x64xf32>
    %11 = vector.extract_strided_slice %9 {offsets = [0, 0], sizes = [32, 64], strides = [1, 1]} : vector<32x96xf32> to vector<32x64xf32>
    %12 = arith.addf %10, %11 : vector<32x64xf32>
    %13 = arith.negf %12 : vector<32x64xf32>
    %14 = math.exp %13 : vector<32x64xf32>
    %cst_11 = arith.constant 1.000000e+00 : f32
    %15 = vector.broadcast %cst_11 : f32 to vector<32x64xf32>
    %16 = arith.addf %15, %14 : vector<32x64xf32>
    %17 = arith.divf %15, %16 : vector<32x64xf32>
    %18 = vector.extract_strided_slice %17 {offsets = [0, 0], sizes = [32, 32], strides = [1, 1]} : vector<32x64xf32> to vector<32x32xf32>
    %19 = vector.extract_strided_slice %17 {offsets = [0, 32], sizes = [32, 32], strides = [1, 1]} : vector<32x64xf32> to vector<32x32xf32>
    %20 = vector.extract_strided_slice %8 {offsets = [0, 64], sizes = [32, 32], strides = [1, 1]} : vector<32x96xf32> to vector<32x32xf32>
    %21 = vector.extract_strided_slice %9 {offsets = [0, 64], sizes = [32, 32], strides = [1, 1]} : vector<32x96xf32> to vector<32x32xf32>
    %22 = vector.broadcast %5 : vector<1x32xf32> to vector<32x32xf32>
    %23 = arith.addf %21, %22 : vector<32x32xf32>
    %24 = arith.mulf %18, %23 : vector<32x32xf32>
    %25 = arith.addf %20, %24 : vector<32x32xf32>
    %26 = math.tanh %25 : vector<32x32xf32>
    %cst_12 = arith.constant 1.000000e+00 : f32
    %27 = vector.broadcast %cst_12 : f32 to vector<32x32xf32>
    %28 = arith.subf %27, %19 : vector<32x32xf32>
    %29 = arith.mulf %28, %26 : vector<32x32xf32>
    %30 = arith.mulf %19, %6 : vector<32x32xf32>
    %31 = arith.addf %29, %30 : vector<32x32xf32>
    %32 = vector.extract_strided_slice %2 {offsets = [32, 0], sizes = [32, 96], strides = [1, 1]} : vector<256x96xf32> to vector<32x96xf32>
    %33 = arith.addf %32, %3 : vector<32x96xf32>
    %cst_13 = arith.constant dense<0.000000e+00> : vector<32x96xf32>
    %34 = tpu.matmul %31, %4, %cst_13 {dimension_numbers = #tpu.dot_dimension_numbers<[1], [0], [0], [1], [0, 0, 1, 1], [], []>} : vector<32x32xf32>, vector<32x96xf32>, vector<32x96xf32> -> vector<32x96xf32>
    %35 = vector.extract_strided_slice %33 {offsets = [0, 0], sizes = [32, 64], strides = [1, 1]} : vector<32x96xf32> to vector<32x64xf32>
    %36 = vector.extract_strided_slice %34 {offsets = [0, 0], sizes = [32, 64], strides = [1, 1]} : vector<32x96xf32> to vector<32x64xf32>
    %37 = arith.addf %35, %36 : vector<32x64xf32>
    %38 = arith.negf %37 : vector<32x64xf32>
    %39 = math.exp %38 : vector<32x64xf32>
    %cst_14 = arith.constant 1.000000e+00 : f32
    %40 = vector.broadcast %cst_14 : f32 to vector<32x64xf32>
    %41 = arith.addf %40, %39 : vector<32x64xf32>
    %42 = arith.divf %40, %41 : vector<32x64xf32>
    %43 = vector.extract_strided_slice %42 {offsets = [0, 0], sizes = [32, 32], strides = [1, 1]} : vector<32x64xf32> to vector<32x32xf32>
    %44 = vector.extract_strided_slice %42 {offsets = [0, 32], sizes = [32, 32], strides = [1, 1]} : vector<32x64xf32> to vector<32x32xf32>
    %45 = vector.extract_strided_slice %33 {offsets = [0, 64], sizes = [32, 32], strides = [1, 1]} : vector<32x96xf32> to vector<32x32xf32>
    %46 = vector.extract_strided_slice %34 {offsets = [0, 64], sizes = [32, 32], strides = [1, 1]} : vector<32x96xf32> to vector<32x32xf32>
    %47 = vector.broadcast %5 : vector<1x32xf32> to vector<32x32xf32>
    %48 = arith.addf %46, %47 : vector<32x32xf32>
    %49 = arith.mulf %43, %48 : vector<32x32xf32>
    %50 = arith.addf %45, %49 : vector<32x32xf32>
    %51 = math.tanh %50 : vector<32x32xf32>
    %cst_15 = arith.constant 1.000000e+00 : f32
    %52 = vector.broadcast %cst_15 : f32 to vector<32x32xf32>
    %53 = arith.subf %52, %44 : vector<32x32xf32>
    %54 = arith.mulf %53, %51 : vector<32x32xf32>
    %55 = arith.mulf %44, %31 : vector<32x32xf32>
    %56 = arith.addf %54, %55 : vector<32x32xf32>
    %57 = vector.extract_strided_slice %2 {offsets = [64, 0], sizes = [32, 96], strides = [1, 1]} : vector<256x96xf32> to vector<32x96xf32>
    %58 = arith.addf %57, %3 : vector<32x96xf32>
    %cst_16 = arith.constant dense<0.000000e+00> : vector<32x96xf32>
    %59 = tpu.matmul %56, %4, %cst_16 {dimension_numbers = #tpu.dot_dimension_numbers<[1], [0], [0], [1], [0, 0, 1, 1], [], []>} : vector<32x32xf32>, vector<32x96xf32>, vector<32x96xf32> -> vector<32x96xf32>
    %60 = vector.extract_strided_slice %58 {offsets = [0, 0], sizes = [32, 64], strides = [1, 1]} : vector<32x96xf32> to vector<32x64xf32>
    %61 = vector.extract_strided_slice %59 {offsets = [0, 0], sizes = [32, 64], strides = [1, 1]} : vector<32x96xf32> to vector<32x64xf32>
    %62 = arith.addf %60, %61 : vector<32x64xf32>
    %63 = arith.negf %62 : vector<32x64xf32>
    %64 = math.exp %63 : vector<32x64xf32>
    %cst_17 = arith.constant 1.000000e+00 : f32
    %65 = vector.broadcast %cst_17 : f32 to vector<32x64xf32>
    %66 = arith.addf %65, %64 : vector<32x64xf32>
    %67 = arith.divf %65, %66 : vector<32x64xf32>
    %68 = vector.extract_strided_slice %67 {offsets = [0, 0], sizes = [32, 32], strides = [1, 1]} : vector<32x64xf32> to vector<32x32xf32>
    %69 = vector.extract_strided_slice %67 {offsets = [0, 32], sizes = [32, 32], strides = [1, 1]} : vector<32x64xf32> to vector<32x32xf32>
    %70 = vector.extract_strided_slice %58 {offsets = [0, 64], sizes = [32, 32], strides = [1, 1]} : vector<32x96xf32> to vector<32x32xf32>
    %71 = vector.extract_strided_slice %59 {offsets = [0, 64], sizes = [32, 32], strides = [1, 1]} : vector<32x96xf32> to vector<32x32xf32>
    %72 = vector.broadcast %5 : vector<1x32xf32> to vector<32x32xf32>
    %73 = arith.addf %71, %72 : vector<32x32xf32>
    %74 = arith.mulf %68, %73 : vector<32x32xf32>
    %75 = arith.addf %70, %74 : vector<32x32xf32>
    %76 = math.tanh %75 : vector<32x32xf32>
    %cst_18 = arith.constant 1.000000e+00 : f32
    %77 = vector.broadcast %cst_18 : f32 to vector<32x32xf32>
    %78 = arith.subf %77, %69 : vector<32x32xf32>
    %79 = arith.mulf %78, %76 : vector<32x32xf32>
    %80 = arith.mulf %69, %56 : vector<32x32xf32>
    %81 = arith.addf %79, %80 : vector<32x32xf32>
    %82 = vector.extract_strided_slice %2 {offsets = [96, 0], sizes = [32, 96], strides = [1, 1]} : vector<256x96xf32> to vector<32x96xf32>
    %83 = arith.addf %82, %3 : vector<32x96xf32>
    %cst_19 = arith.constant dense<0.000000e+00> : vector<32x96xf32>
    %84 = tpu.matmul %81, %4, %cst_19 {dimension_numbers = #tpu.dot_dimension_numbers<[1], [0], [0], [1], [0, 0, 1, 1], [], []>} : vector<32x32xf32>, vector<32x96xf32>, vector<32x96xf32> -> vector<32x96xf32>
    %85 = vector.extract_strided_slice %83 {offsets = [0, 0], sizes = [32, 64], strides = [1, 1]} : vector<32x96xf32> to vector<32x64xf32>
    %86 = vector.extract_strided_slice %84 {offsets = [0, 0], sizes = [32, 64], strides = [1, 1]} : vector<32x96xf32> to vector<32x64xf32>
    %87 = arith.addf %85, %86 : vector<32x64xf32>
    %88 = arith.negf %87 : vector<32x64xf32>
    %89 = math.exp %88 : vector<32x64xf32>
    %cst_20 = arith.constant 1.000000e+00 : f32
    %90 = vector.broadcast %cst_20 : f32 to vector<32x64xf32>
    %91 = arith.addf %90, %89 : vector<32x64xf32>
    %92 = arith.divf %90, %91 : vector<32x64xf32>
    %93 = vector.extract_strided_slice %92 {offsets = [0, 0], sizes = [32, 32], strides = [1, 1]} : vector<32x64xf32> to vector<32x32xf32>
    %94 = vector.extract_strided_slice %92 {offsets = [0, 32], sizes = [32, 32], strides = [1, 1]} : vector<32x64xf32> to vector<32x32xf32>
    %95 = vector.extract_strided_slice %83 {offsets = [0, 64], sizes = [32, 32], strides = [1, 1]} : vector<32x96xf32> to vector<32x32xf32>
    %96 = vector.extract_strided_slice %84 {offsets = [0, 64], sizes = [32, 32], strides = [1, 1]} : vector<32x96xf32> to vector<32x32xf32>
    %97 = vector.broadcast %5 : vector<1x32xf32> to vector<32x32xf32>
    %98 = arith.addf %96, %97 : vector<32x32xf32>
    %99 = arith.mulf %93, %98 : vector<32x32xf32>
    %100 = arith.addf %95, %99 : vector<32x32xf32>
    %101 = math.tanh %100 : vector<32x32xf32>
    %cst_21 = arith.constant 1.000000e+00 : f32
    %102 = vector.broadcast %cst_21 : f32 to vector<32x32xf32>
    %103 = arith.subf %102, %94 : vector<32x32xf32>
    %104 = arith.mulf %103, %101 : vector<32x32xf32>
    %105 = arith.mulf %94, %81 : vector<32x32xf32>
    %106 = arith.addf %104, %105 : vector<32x32xf32>
    %107 = vector.extract_strided_slice %2 {offsets = [128, 0], sizes = [32, 96], strides = [1, 1]} : vector<256x96xf32> to vector<32x96xf32>
    %108 = arith.addf %107, %3 : vector<32x96xf32>
    %cst_22 = arith.constant dense<0.000000e+00> : vector<32x96xf32>
    %109 = tpu.matmul %106, %4, %cst_22 {dimension_numbers = #tpu.dot_dimension_numbers<[1], [0], [0], [1], [0, 0, 1, 1], [], []>} : vector<32x32xf32>, vector<32x96xf32>, vector<32x96xf32> -> vector<32x96xf32>
    %110 = vector.extract_strided_slice %108 {offsets = [0, 0], sizes = [32, 64], strides = [1, 1]} : vector<32x96xf32> to vector<32x64xf32>
    %111 = vector.extract_strided_slice %109 {offsets = [0, 0], sizes = [32, 64], strides = [1, 1]} : vector<32x96xf32> to vector<32x64xf32>
    %112 = arith.addf %110, %111 : vector<32x64xf32>
    %113 = arith.negf %112 : vector<32x64xf32>
    %114 = math.exp %113 : vector<32x64xf32>
    %cst_23 = arith.constant 1.000000e+00 : f32
    %115 = vector.broadcast %cst_23 : f32 to vector<32x64xf32>
    %116 = arith.addf %115, %114 : vector<32x64xf32>
    %117 = arith.divf %115, %116 : vector<32x64xf32>
    %118 = vector.extract_strided_slice %117 {offsets = [0, 0], sizes = [32, 32], strides = [1, 1]} : vector<32x64xf32> to vector<32x32xf32>
    %119 = vector.extract_strided_slice %117 {offsets = [0, 32], sizes = [32, 32], strides = [1, 1]} : vector<32x64xf32> to vector<32x32xf32>
    %120 = vector.extract_strided_slice %108 {offsets = [0, 64], sizes = [32, 32], strides = [1, 1]} : vector<32x96xf32> to vector<32x32xf32>
    %121 = vector.extract_strided_slice %109 {offsets = [0, 64], sizes = [32, 32], strides = [1, 1]} : vector<32x96xf32> to vector<32x32xf32>
    %122 = vector.broadcast %5 : vector<1x32xf32> to vector<32x32xf32>
    %123 = arith.addf %121, %122 : vector<32x32xf32>
    %124 = arith.mulf %118, %123 : vector<32x32xf32>
    %125 = arith.addf %120, %124 : vector<32x32xf32>
    %126 = math.tanh %125 : vector<32x32xf32>
    %cst_24 = arith.constant 1.000000e+00 : f32
    %127 = vector.broadcast %cst_24 : f32 to vector<32x32xf32>
    %128 = arith.subf %127, %119 : vector<32x32xf32>
    %129 = arith.mulf %128, %126 : vector<32x32xf32>
    %130 = arith.mulf %119, %106 : vector<32x32xf32>
    %131 = arith.addf %129, %130 : vector<32x32xf32>
    %132 = vector.extract_strided_slice %2 {offsets = [160, 0], sizes = [32, 96], strides = [1, 1]} : vector<256x96xf32> to vector<32x96xf32>
    %133 = arith.addf %132, %3 : vector<32x96xf32>
    %cst_25 = arith.constant dense<0.000000e+00> : vector<32x96xf32>
    %134 = tpu.matmul %131, %4, %cst_25 {dimension_numbers = #tpu.dot_dimension_numbers<[1], [0], [0], [1], [0, 0, 1, 1], [], []>} : vector<32x32xf32>, vector<32x96xf32>, vector<32x96xf32> -> vector<32x96xf32>
    %135 = vector.extract_strided_slice %133 {offsets = [0, 0], sizes = [32, 64], strides = [1, 1]} : vector<32x96xf32> to vector<32x64xf32>
    %136 = vector.extract_strided_slice %134 {offsets = [0, 0], sizes = [32, 64], strides = [1, 1]} : vector<32x96xf32> to vector<32x64xf32>
    %137 = arith.addf %135, %136 : vector<32x64xf32>
    %138 = arith.negf %137 : vector<32x64xf32>
    %139 = math.exp %138 : vector<32x64xf32>
    %cst_26 = arith.constant 1.000000e+00 : f32
    %140 = vector.broadcast %cst_26 : f32 to vector<32x64xf32>
    %141 = arith.addf %140, %139 : vector<32x64xf32>
    %142 = arith.divf %140, %141 : vector<32x64xf32>
    %143 = vector.extract_strided_slice %142 {offsets = [0, 0], sizes = [32, 32], strides = [1, 1]} : vector<32x64xf32> to vector<32x32xf32>
    %144 = vector.extract_strided_slice %142 {offsets = [0, 32], sizes = [32, 32], strides = [1, 1]} : vector<32x64xf32> to vector<32x32xf32>
    %145 = vector.extract_strided_slice %133 {offsets = [0, 64], sizes = [32, 32], strides = [1, 1]} : vector<32x96xf32> to vector<32x32xf32>
    %146 = vector.extract_strided_slice %134 {offsets = [0, 64], sizes = [32, 32], strides = [1, 1]} : vector<32x96xf32> to vector<32x32xf32>
    %147 = vector.broadcast %5 : vector<1x32xf32> to vector<32x32xf32>
    %148 = arith.addf %146, %147 : vector<32x32xf32>
    %149 = arith.mulf %143, %148 : vector<32x32xf32>
    %150 = arith.addf %145, %149 : vector<32x32xf32>
    %151 = math.tanh %150 : vector<32x32xf32>
    %cst_27 = arith.constant 1.000000e+00 : f32
    %152 = vector.broadcast %cst_27 : f32 to vector<32x32xf32>
    %153 = arith.subf %152, %144 : vector<32x32xf32>
    %154 = arith.mulf %153, %151 : vector<32x32xf32>
    %155 = arith.mulf %144, %131 : vector<32x32xf32>
    %156 = arith.addf %154, %155 : vector<32x32xf32>
    %157 = vector.extract_strided_slice %2 {offsets = [192, 0], sizes = [32, 96], strides = [1, 1]} : vector<256x96xf32> to vector<32x96xf32>
    %158 = arith.addf %157, %3 : vector<32x96xf32>
    %cst_28 = arith.constant dense<0.000000e+00> : vector<32x96xf32>
    %159 = tpu.matmul %156, %4, %cst_28 {dimension_numbers = #tpu.dot_dimension_numbers<[1], [0], [0], [1], [0, 0, 1, 1], [], []>} : vector<32x32xf32>, vector<32x96xf32>, vector<32x96xf32> -> vector<32x96xf32>
    %160 = vector.extract_strided_slice %158 {offsets = [0, 0], sizes = [32, 64], strides = [1, 1]} : vector<32x96xf32> to vector<32x64xf32>
    %161 = vector.extract_strided_slice %159 {offsets = [0, 0], sizes = [32, 64], strides = [1, 1]} : vector<32x96xf32> to vector<32x64xf32>
    %162 = arith.addf %160, %161 : vector<32x64xf32>
    %163 = arith.negf %162 : vector<32x64xf32>
    %164 = math.exp %163 : vector<32x64xf32>
    %cst_29 = arith.constant 1.000000e+00 : f32
    %165 = vector.broadcast %cst_29 : f32 to vector<32x64xf32>
    %166 = arith.addf %165, %164 : vector<32x64xf32>
    %167 = arith.divf %165, %166 : vector<32x64xf32>
    %168 = vector.extract_strided_slice %167 {offsets = [0, 0], sizes = [32, 32], strides = [1, 1]} : vector<32x64xf32> to vector<32x32xf32>
    %169 = vector.extract_strided_slice %167 {offsets = [0, 32], sizes = [32, 32], strides = [1, 1]} : vector<32x64xf32> to vector<32x32xf32>
    %170 = vector.extract_strided_slice %158 {offsets = [0, 64], sizes = [32, 32], strides = [1, 1]} : vector<32x96xf32> to vector<32x32xf32>
    %171 = vector.extract_strided_slice %159 {offsets = [0, 64], sizes = [32, 32], strides = [1, 1]} : vector<32x96xf32> to vector<32x32xf32>
    %172 = vector.broadcast %5 : vector<1x32xf32> to vector<32x32xf32>
    %173 = arith.addf %171, %172 : vector<32x32xf32>
    %174 = arith.mulf %168, %173 : vector<32x32xf32>
    %175 = arith.addf %170, %174 : vector<32x32xf32>
    %176 = math.tanh %175 : vector<32x32xf32>
    %cst_30 = arith.constant 1.000000e+00 : f32
    %177 = vector.broadcast %cst_30 : f32 to vector<32x32xf32>
    %178 = arith.subf %177, %169 : vector<32x32xf32>
    %179 = arith.mulf %178, %176 : vector<32x32xf32>
    %180 = arith.mulf %169, %156 : vector<32x32xf32>
    %181 = arith.addf %179, %180 : vector<32x32xf32>
    %182 = vector.extract_strided_slice %2 {offsets = [224, 0], sizes = [32, 96], strides = [1, 1]} : vector<256x96xf32> to vector<32x96xf32>
    %183 = arith.addf %182, %3 : vector<32x96xf32>
    %cst_31 = arith.constant dense<0.000000e+00> : vector<32x96xf32>
    %184 = tpu.matmul %181, %4, %cst_31 {dimension_numbers = #tpu.dot_dimension_numbers<[1], [0], [0], [1], [0, 0, 1, 1], [], []>} : vector<32x32xf32>, vector<32x96xf32>, vector<32x96xf32> -> vector<32x96xf32>
    %185 = vector.extract_strided_slice %183 {offsets = [0, 0], sizes = [32, 64], strides = [1, 1]} : vector<32x96xf32> to vector<32x64xf32>
    %186 = vector.extract_strided_slice %184 {offsets = [0, 0], sizes = [32, 64], strides = [1, 1]} : vector<32x96xf32> to vector<32x64xf32>
    %187 = arith.addf %185, %186 : vector<32x64xf32>
    %188 = arith.negf %187 : vector<32x64xf32>
    %189 = math.exp %188 : vector<32x64xf32>
    %cst_32 = arith.constant 1.000000e+00 : f32
    %190 = vector.broadcast %cst_32 : f32 to vector<32x64xf32>
    %191 = arith.addf %190, %189 : vector<32x64xf32>
    %192 = arith.divf %190, %191 : vector<32x64xf32>
    %193 = vector.extract_strided_slice %192 {offsets = [0, 0], sizes = [32, 32], strides = [1, 1]} : vector<32x64xf32> to vector<32x32xf32>
    %194 = vector.extract_strided_slice %192 {offsets = [0, 32], sizes = [32, 32], strides = [1, 1]} : vector<32x64xf32> to vector<32x32xf32>
    %195 = vector.extract_strided_slice %183 {offsets = [0, 64], sizes = [32, 32], strides = [1, 1]} : vector<32x96xf32> to vector<32x32xf32>
    %196 = vector.extract_strided_slice %184 {offsets = [0, 64], sizes = [32, 32], strides = [1, 1]} : vector<32x96xf32> to vector<32x32xf32>
    %197 = vector.broadcast %5 : vector<1x32xf32> to vector<32x32xf32>
    %198 = arith.addf %196, %197 : vector<32x32xf32>
    %199 = arith.mulf %193, %198 : vector<32x32xf32>
    %200 = arith.addf %195, %199 : vector<32x32xf32>
    %201 = math.tanh %200 : vector<32x32xf32>
    %cst_33 = arith.constant 1.000000e+00 : f32
    %202 = vector.broadcast %cst_33 : f32 to vector<32x32xf32>
    %203 = arith.subf %202, %194 : vector<32x32xf32>
    %204 = arith.mulf %203, %201 : vector<32x32xf32>
    %205 = arith.mulf %194, %181 : vector<32x32xf32>
    %206 = arith.addf %204, %205 : vector<32x32xf32>
    %c0_34 = arith.constant 0 : index
    %c0_35 = arith.constant 0 : index
    %207 = vector.load %arg5[%c0_34, %c0_35] : memref<128x32xf32, #tpu.memory_space<vmem>>, vector<128x32xf32>
    %cst_36 = arith.constant dense<0.000000e+00> : vector<128x32xf32>
    %208 = tpu.matmul %207, %206, %cst_36 {dimension_numbers = #tpu.dot_dimension_numbers<[1], [0], [0], [1], [0, 0, 1, 1], [], []>} : vector<128x32xf32>, vector<32x32xf32>, vector<128x32xf32> -> vector<128x32xf32>
    %c0_37 = arith.constant 0 : index
    %c0_38 = arith.constant 0 : index
    %209 = vector.load %arg6[%c0_37, %c0_38] : memref<160x16xf32, #tpu.memory_space<vmem>>, vector<160x16xf32>
    %210 = vector.extract_strided_slice %209 {offsets = [0, 0], sizes = [32, 16], strides = [1, 1]} : vector<160x16xf32> to vector<32x16xf32>
    %cst_39 = arith.constant dense<0.000000e+00> : vector<32x16xf32>
    %211 = tpu.matmul %206, %210, %cst_39 {dimension_numbers = #tpu.dot_dimension_numbers<[1], [0], [0], [1], [0, 0, 1, 1], [], []>} : vector<32x32xf32>, vector<32x16xf32>, vector<32x16xf32> -> vector<32x16xf32>
    %212 = vector.extract_strided_slice %208 {offsets = [0, 0], sizes = [32, 32], strides = [1, 1]} : vector<128x32xf32> to vector<32x32xf32>
    %213 = vector.extract_strided_slice %209 {offsets = [32, 0], sizes = [32, 16], strides = [1, 1]} : vector<160x16xf32> to vector<32x16xf32>
    %cst_40 = arith.constant dense<0.000000e+00> : vector<32x16xf32>
    %214 = tpu.matmul %212, %213, %cst_40 {dimension_numbers = #tpu.dot_dimension_numbers<[1], [0], [0], [1], [0, 0, 1, 1], [], []>} : vector<32x32xf32>, vector<32x16xf32>, vector<32x16xf32> -> vector<32x16xf32>
    %215 = arith.addf %211, %214 : vector<32x16xf32>
    %216 = vector.extract_strided_slice %208 {offsets = [32, 0], sizes = [32, 32], strides = [1, 1]} : vector<128x32xf32> to vector<32x32xf32>
    %217 = vector.extract_strided_slice %209 {offsets = [64, 0], sizes = [32, 16], strides = [1, 1]} : vector<160x16xf32> to vector<32x16xf32>
    %cst_41 = arith.constant dense<0.000000e+00> : vector<32x16xf32>
    %218 = tpu.matmul %216, %217, %cst_41 {dimension_numbers = #tpu.dot_dimension_numbers<[1], [0], [0], [1], [0, 0, 1, 1], [], []>} : vector<32x32xf32>, vector<32x16xf32>, vector<32x16xf32> -> vector<32x16xf32>
    %219 = arith.addf %215, %218 : vector<32x16xf32>
    %220 = vector.extract_strided_slice %208 {offsets = [64, 0], sizes = [32, 32], strides = [1, 1]} : vector<128x32xf32> to vector<32x32xf32>
    %221 = vector.extract_strided_slice %209 {offsets = [96, 0], sizes = [32, 16], strides = [1, 1]} : vector<160x16xf32> to vector<32x16xf32>
    %cst_42 = arith.constant dense<0.000000e+00> : vector<32x16xf32>
    %222 = tpu.matmul %220, %221, %cst_42 {dimension_numbers = #tpu.dot_dimension_numbers<[1], [0], [0], [1], [0, 0, 1, 1], [], []>} : vector<32x32xf32>, vector<32x16xf32>, vector<32x16xf32> -> vector<32x16xf32>
    %223 = arith.addf %219, %222 : vector<32x16xf32>
    %224 = vector.extract_strided_slice %208 {offsets = [96, 0], sizes = [32, 32], strides = [1, 1]} : vector<128x32xf32> to vector<32x32xf32>
    %225 = vector.extract_strided_slice %209 {offsets = [128, 0], sizes = [32, 16], strides = [1, 1]} : vector<160x16xf32> to vector<32x16xf32>
    %cst_43 = arith.constant dense<0.000000e+00> : vector<32x16xf32>
    %226 = tpu.matmul %224, %225, %cst_43 {dimension_numbers = #tpu.dot_dimension_numbers<[1], [0], [0], [1], [0, 0, 1, 1], [], []>} : vector<32x32xf32>, vector<32x16xf32>, vector<32x16xf32> -> vector<32x16xf32>
    %227 = arith.addf %223, %226 : vector<32x16xf32>
    %c0_44 = arith.constant 0 : index
    %c0_45 = arith.constant 0 : index
    %228 = vector.load %arg7[%c0_44, %c0_45] : memref<1x16xf32, #tpu.memory_space<vmem>>, vector<1x16xf32>
    %229 = vector.broadcast %228 : vector<1x16xf32> to vector<32x16xf32>
    %230 = arith.addf %227, %229 : vector<32x16xf32>
    %c0_46 = arith.constant 0 : index
    %c0_47 = arith.constant 0 : index
    %231 = vector.load %arg8[%c0_46, %c0_47] : memref<32x16xf32, #tpu.memory_space<vmem>>, vector<32x16xf32>
    tpu.vector_store %arg8[%c0_46, %c0_47], %230 {strides = array<i32>} : memref<32x16xf32, #tpu.memory_space<vmem>>, vector<32x16xf32>,
    return
  }
}

</mosaic_0001>

<bundles_post_ra>
// kernel: tpu_custom_call.1
= control target key start
LH: loop header
LB: loop body
LE: loop exit
PB: predicated region body
PF: predicated region fallthrough
CT: control target
= control target key end

     0   :  { %vm159_vm0 = vcmask 1043456   ;;  %vm62_vm1 = vcmask 31744   ;;  %v3638_v3 = vmov 0.0   ;;  %s3640_s10 = smov 96   ;;  %vm401_vm2 = vcmask 261120   ;;  %s4482_s3 = inlined_call_operand.vmem [shape: f32[32,96], index: 3, kind: input, shape index: {}]   ;;  %s4483_s1 = inlined_call_operand.vmem [shape: f32[4,96], index: 1, kind: input, shape index: {}]   ;;  %s4484_s0 = inlined_call_operand.vmem [shape: f32[256,4], index: 0, kind: input, shape index: {}]   ;;  %s4485_s4 = inlined_call_operand.vmem [shape: f32[1,32], index: 4, kind: input, shape index: {}]   ;;  %s4486_s2 = inlined_call_operand.vmem [shape: f32[32,96], index: 2, kind: input, shape index: {}]   ;;  %s4487_s5 = inlined_call_operand.vmem [shape: f32[128,32], index: 5, kind: input, shape index: {}]   ;;  %s4488_s6 = inlined_call_operand.vmem [shape: f32[160,16], index: 6, kind: input, shape index: {}]   ;;  %s4489_s7 = inlined_call_operand.vmem [shape: f32[1,16], index: 7, kind: input, shape index: {}]   ;;  %s4490_s8 = inlined_call_operand.vmem [shape: f32[32,16], index: 8, kind: output, shape index: {}]  }
   0x1   :  { %v3689_v0 = vld [vmem:[%s4482_s3 + $0x18] sm:$0xff]  ;;  %v3694_v1 = vld [vmem:[%s4482_s3 + $0x10] sm:$0xff]  ;;  %v61_v2 = vld [vmem:[%s4483_s1] sm:$0xf]  ;;  %3229 = vmatprep.mubr.f32.mxu1 %v3638_v3  ;;  %vm2874_vm3 = vcmask 130048  }
   0x2   :  { %3221 = vmatprep.subr.mxu1 %v3689_v0  ;;  %3171 = vmatprep.subr.msk.mxu0 %vm159_vm0, %v61_v2  ;;  %v29_v4 = vld [vmem:[%s4484_s0] sm:$0xff]  ;;  %v30_v5 = vld [vmem:[%s4484_s0 + $0x8] sm:$0xff]  ;;  %v31_v7 = vld [vmem:[%s4484_s0 + $0x10] sm:$0xff] }
   0x3   :  { %3222 = vmatpush3.msra.mxu1 %v3689_v0  ;;  %v3710_v6 = vld [vmem:[%s4482_s3 + $0x8] sm:$0xff]  ;;  %3172 = vmatpush3.msk.msra.mxu0 %vm159_vm0, %v61_v2  ;;  %v2920_v8 = vld [vmem:[%s4485_s4] ss:$0 sm:$0xff]  ;;  %v32_v10 = vld [vmem:[%s4484_s0 + $0x18] sm:$0xff]  ;;  %s3639_s4 = smov 64  }
   0x4   :  { %3223 = vmatprep.subr.mxu1 %v3694_v1  ;;  %3173 = vmatprep.mubr.msk.f32.mxu0 %vm62_vm1, %v29_v4  ;;  %v3725_v9 = vld [vmem:[%s4482_s3] sm:$0xff]  ;;  %v3759_v22 = vld [vmem:[%s4486_s2 + $0x8] sm:$0xff]  ;;  %v3771_v27 = vld [vmem:[%s4486_s2 + $0x18] sm:$0xff] }
   0x5   :  { %3224 = vmatpush3.msra.mxu1 %v3694_v1  ;;  %3174 = vmatmul.mubr.msk.f32.vlgmr.msra.gmra.mxu0 %vm62_vm1, %v30_v5  ;;  %v3764_v23 = vld [vmem:[%s4486_s2] sm:$0xff]  ;;  %v3776_v29 = vld [vmem:[%s4486_s2 + $0x10] sm:$0xff] }
   0x6   :  { %3225 = vmatprep.subr.mxu1 %v3710_v6  ;;  %3176 = vmatprep.mubr.msk.f32.mxu0 %vm62_vm1, %v31_v7 }
   0x7   :  { %3226 = vmatpush3.msra.mxu1 %v3710_v6  ;;  %523 = vrot.lane.b32.xlu0 %v2920_v8, %s3639_s4 }
   0x8   :  { %3227 = vmatprep.subr.mxu1 %v3725_v9 }
   0x9   :  { %3228 = vmatpush3.msra.mxu1 %v3725_v9  ;;  %3177 = vmatmul.mubr.msk.f32.gmra.mxu0 %vm62_vm1, %v32_v10 }
   0xa   :  { %3230 = vmatmul.mubr.f32.vlgmr.msra.gmra.mxu1 %v3638_v3  ;;  %3235 = vmatprep.subr.mxu1 %v3689_v0 }
   0xb   :  { %3232 = vmatprep.mubr.f32.mxu1 %v3638_v3  ;;  %3236 = vmatpush3.msra.mxu1 %v3689_v0 }
   0xc   :  { %3237 = vmatprep.subr.mxu1 %v3694_v1 }
   0xd   :  { %3238 = vmatpush3.msra.mxu1 %v3694_v1 }
   0xe   :  { %3233 = vmatmul.mubr.f32.gmra.mxu1 %v3638_v3  ;;  %3239 = vmatprep.subr.mxu1 %v3710_v6 }
   0xf   :  { %3240 = vmatpush3.msra.mxu1 %v3710_v6 }
  0x10   :  { %3241 = vmatprep.subr.mxu1 %v3725_v9 }
  0x11   :  { %3242 = vmatpush3.msra.mxu1 %v3725_v9 }
  0x12   :  { %3249 = vmatprep.subr.mxu1 %v3689_v0 }
  0x79   :  { %v3746_v11 = vpop.permute.xlu0 %523 }
  0xc5   :  { %v3175_v20 = vpop.f32.mrf.mxu0 }
  0xc6   :  { %v398_v25 = vadd.f32 %v3175_v20, %v3759_v22 }
  0xc7   :  { %v229_v21 = vpop.f32.mrf.mxu0 }
  0xc8   :  { %v397_v26 = vadd.f32 %v3764_v23, %v229_v21 }
  0xc9   :  { %v3178_v24 = vpop.f32.mrf.mxu0 }
  0xca   :  { %v3231_v12 = vpop.f32.mrf.mxu1  ;;  %v400_v31 = vadd.f32 %v3178_v24, %v3771_v27 }
  0xcb   :  { %v527_v13 = vadd.f32 %v3231_v12, %v3746_v11  ;;  %v239_v28 = vpop.f32.mrf.mxu0  ;;  %v491_v30 = vadd.f32 %v3231_v12, %v398_v25 }
  0xcc   :  { %v471_v14 = vpop.f32.mrf.mxu1  ;;  %v399_v33 = vadd.f32 %v3776_v29, %v239_v28 }
  0xcd   :  { %v526_v15 = vadd.f32 %v3746_v11, %v471_v14  ;;  %536 = vrot.lane.b32.xlu1 %v527_v13, %s3639_s4  ;;  %v490_v32 = vadd.f32 %v471_v14, %v397_v26  ;;  %v2917_v34 = vmul.f32 -1.442695, %v491_v30  ;;  %v33_v13 = vld [vmem:[%s4484_s0 + $0x20] sm:$0xff]  ;;  %v34_v14 = vld [vmem:[%s4484_s0 + $0x28] sm:$0xff] }
  0xce   :  { %v3234_v16 = vpop.f32.mrf.mxu1  ;;  %3179 = vmatprep.mubr.msk.f32.mxu0 %vm62_vm1, %v33_v13 }
  0xcf   :  { %534 = vrot.lane.b32.xlu0 %v526_v15, %s3639_s4  ;;  %v529_v18 = vadd.f32 %v3234_v16, %v3746_v11  ;;  %v493_v35 = vadd.f32 %v3234_v16, %v400_v31  ;;  %v2916_v36 = vmul.f32 -1.442695, %v490_v32  ;;  %3438 = vpow2.f32 %v2917_v34  ;;  %3180 = vmatmul.mubr.msk.f32.gmra.mxu0 %vm62_vm1, %v34_v14  ;;  %v35_v15 = vld [vmem:[%s4484_s0 + $0x30] sm:$0xff]  ;;  %v36_v16 = vld [vmem:[%s4484_s0 + $0x38] sm:$0xff] }
  0xd0   :  { %v481_v17 = vpop.f32.mrf.mxu1  ;;  %3182 = vmatprep.mubr.msk.f32.mxu0 %vm62_vm1, %v35_v15 }
  0xd1   :  { %v528_v19 = vadd.f32 %v3746_v11, %v481_v17  ;;  %v492_v37 = vadd.f32 %v481_v17, %v399_v33  ;;  %v2919_v38 = vmul.f32 -1.442695, %v493_v35  ;;  %3440 = vpow2.f32 %v2916_v36 }
  0xd3   :  { %540 = vrot.lane.b32.xlu0 %v529_v18, %s3639_s4  ;;  %538 = vrot.lane.b32.xlu1 %v528_v19, %s3639_s4  ;;  %v2918_v39 = vmul.f32 -1.442695, %v492_v37  ;;  %3442 = vpow2.f32 %v2919_v38 }
  0xd4   :  { %3183 = vmatmul.mubr.msk.f32.gmra.mxu0 %vm62_vm1, %v36_v16 }
  0xd5   :  { %3444 = vpow2.f32 %v2918_v39 }
  0xdc   :  { %v3439_v40 = vpop.eup %3438 }
  0xdd   :  { %v507_v42 = vadd.f32 1.0, %v3439_v40 }
  0xde   :  { %v3441_v41 = vpop.eup %3440 }
  0xdf   :  { %v506_v44 = vadd.f32 1.0, %v3441_v41  ;;  %3446 = vrcp.f32 %v507_v42 }
  0xe0   :  { %v3443_v43 = vpop.eup %3442 }
  0xe1   :  { %v509_v46 = vadd.f32 1.0, %v3443_v43  ;;  %3448 = vrcp.f32 %v506_v44 }
  0xe2   :  { %v3445_v45 = vpop.eup %3444 }
  0xe3   :  { %v508_v47 = vadd.f32 1.0, %v3445_v45  ;;  %3450 = vrcp.f32 %v509_v46 }
  0xe5   :  { %3452 = vrcp.f32 %v508_v47 }
  0xec   :  { %v3447_v48 = vpop.eup %3446 }
  0xed   :  { %v575_v17 = vsub.f32 1.0, %v3447_v48  ;;  %v599_v19 = vmul.f32 0.0, %v3447_v48 }
  0xee   :  { %v3449_v51 = vpop.eup %3448 }
  0xef   :  { %v574_v21 = vsub.f32 1.0, %v3449_v51 }
  0xf0   :  { %v3451_v54 = vpop.eup %3450 }
  0xf1   :  { %v601_v34 = vmul.f32 0.0, %v3451_v54 }
  0xf2   :  { %v3453_v55 = vpop.eup %3452 }
  0xf3   :  { %v600_v37 = vmul.f32 0.0, %v3453_v55 }
 0x13f   :  { %v537_v49 = vpop.permute.xlu1 %536 }
 0x140   :  { %v547_v50 = vmul.f32 %v3447_v48, %v537_v49 }
 0x141   :  { %v535_v52 = vpop.permute.xlu0 %534 }
 0x142   :  { %v546_v53 = vmul.f32 %v3449_v51, %v535_v52  ;;  %556 = vrot.lane.b32.xlu0 %v547_v50, %s3639_s4 }
 0x144   :  { %554 = vrot.lane.b32.xlu1 %v546_v53, %s3639_s4 }
 0x145   :  { %v541_v56 = vpop.permute.xlu0 %540  ;;  %v539_v57 = vpop.permute.xlu1 %538 }
 0x146   :  { %v549_v58 = vmul.f32 %v3451_v54, %v541_v56  ;;  %v548_v59 = vmul.f32 %v3453_v55, %v539_v57 }
 0x148   :  { %560 = vrot.lane.b32.xlu0 %v549_v58, %s3639_s4  ;;  %558 = vrot.lane.b32.xlu1 %v548_v59, %s3639_s4 }
 0x18f   :  { %v3181_v53 = vpop.f32.mrf.mxu0 }
 0x1b4   :  { %v557_v60 = vpop.permute.xlu0 %556 }
 0x1b5   :  { %v567_v61 = vadd.f32 %v557_v60, %v398_v25 }
 0x1b6   :  { %v555_v62 = vpop.permute.xlu1 %554 }
 0x1b7   :  { %3454 = vtanh.f32 %v567_v61  ;;  %v566_v63 = vadd.f32 %v555_v62, %v397_v26  ;;  %v598_v26 = vmul.f32 0.0, %v3449_v51 }
 0x1b9   :  { %3456 = vtanh.f32 %v566_v63 }
 0x1ba   :  { %v561_v2 = vpop.permute.xlu0 %560  ;;  %v559_v3 = vpop.permute.xlu1 %558 }
 0x1bb   :  { %v569_v4 = vadd.f32 %v561_v2, %v400_v31  ;;  %v568_v5 = vadd.f32 %v559_v3, %v399_v33  ;;  %v577_v31 = vsub.f32 1.0, %v3451_v54  ;;  %v576_v33 = vsub.f32 1.0, %v3453_v55  ;;  %v249_v54 = vpop.f32.mrf.mxu0 }
 0x1bc   :  { %v607_v55 = vadd.f32 %v3181_v53, %v3759_v22  ;;  %v606_v57 = vadd.f32 %v3764_v23, %v249_v54  ;;  %v40_v53 = vld [vmem:[%s4484_s0 + $0x58] sm:$0xff] }
 0x1bd   :  { %3458 = vtanh.f32 %v569_v4  ;;  %v3184_v56 = vpop.f32.mrf.mxu0 }
 0x1be   :  { %3460 = vtanh.f32 %v568_v5  ;;  %v609_v60 = vadd.f32 %v3184_v56, %v3771_v27 }
 0x1bf   :  { %v259_v59 = vpop.f32.mrf.mxu0 }
 0x1c0   :  { %v608_v62 = vadd.f32 %v3776_v29, %v259_v59 }
 0x1c4   :  { %v3455_v7 = vpop.eup %3454 }
 0x1c5   :  { %584 = vrot.lane.b32.xlu0 %v3455_v7, %s3640_s10 }
 0x1c6   :  { %v3457_v8 = vpop.eup %3456 }
 0x1c7   :  { %582 = vrot.lane.b32.xlu1 %v3457_v8, %s3640_s10 }
 0x1ca   :  { %v3459_v10 = vpop.eup %3458 }
 0x1cb   :  { %v3461_v12 = vpop.eup %3460  ;;  %588 = vrot.lane.b32.xlu0 %v3459_v10, %s3640_s10 }
 0x1cc   :  { %586 = vrot.lane.b32.xlu1 %v3461_v12, %s3640_s10 }
 0x237   :  { %v585_v18 = vpop.permute.xlu0 %584 }
 0x238   :  { %v595_v20 = vmul.f32 %v585_v18, %v575_v17 }
 0x239   :  { %v583_v24 = vpop.permute.xlu1 %582 }
 0x23a   :  { %v3804_v25 = vadd.f32 %v599_v19, %v595_v20  ;;  %v594_v28 = vmul.f32 %v583_v24, %v574_v21 }
 0x23c   :  { %v3806_v30 = vadd.f32 %v598_v26, %v594_v28  ;;  %616 = vrot.lane.b32.xlu0 %v3804_v25, %s3640_s10 }
 0x23d   :  { %v589_v32 = vpop.permute.xlu0 %588 }
 0x23e   :  { %v597_v35 = vmul.f32 %v589_v32, %v577_v31  ;;  %v587_v36 = vpop.permute.xlu1 %586  ;;  %614 = vrot.lane.b32.xlu1 %v3806_v30, %s3640_s10 }
 0x23f   :  { %v596_v38 = vmul.f32 %v587_v36, %v576_v33 }
 0x240   :  { %v3812_v39 = vadd.f32 %v601_v34, %v597_v35 }
 0x241   :  { %v3814_v40 = vadd.f32 %v600_v37, %v596_v38 }
 0x242   :  { %620 = vrot.lane.b32.xlu0 %v3812_v39, %s3640_s10 }
 0x243   :  { %618 = vrot.lane.b32.xlu1 %v3814_v40, %s3640_s10 }
 0x2ae   :  { %v617_v41 = vpop.permute.xlu0 %616 }
 0x2b0   :  { %v615_v42 = vpop.permute.xlu1 %614 }
 0x2b1   :  { %3243 = vmatprep.mubr.msk.f32.mxu1 %vm401_vm2, %v615_v42 }
 0x2b2   :  { %3244 = vmatmul.mubr.msk.f32.vlgmr.msra.gmra.mxu1 %vm401_vm2, %v617_v41 }
 0x2b3   :  { %3250 = vmatpush3.msra.mxu1 %v3689_v0 }
 0x2b4   :  { %v621_v43 = vpop.permute.xlu0 %620  ;;  %3251 = vmatprep.subr.mxu1 %v3694_v1 }
 0x2b5   :  { %v619_v44 = vpop.permute.xlu1 %618  ;;  %3252 = vmatpush3.msra.mxu1 %v3694_v1 }
 0x2b6   :  { %3246 = vmatprep.mubr.msk.f32.mxu1 %vm401_vm2, %v619_v44  ;;  %3253 = vmatprep.subr.mxu1 %v3710_v6 }
 0x2b7   :  { %3247 = vmatmul.mubr.msk.f32.gmra.mxu1 %vm401_vm2, %v621_v43 }
 0x2b8   :  { %3254 = vmatpush3.msra.mxu1 %v3710_v6 }
 0x2b9   :  { %3255 = vmatprep.subr.mxu1 %v3725_v9 }
 0x2ba   :  { %3256 = vmatpush3.msra.mxu1 %v3725_v9 }
 0x2bb   :  { %3263 = vmatprep.subr.mxu1 %v3689_v0 }
 0x372   :  { %v3245_v45 = vpop.f32.mrf.mxu1 }
 0x373   :  { %v744_v46 = vadd.f32 %v3245_v45, %v3746_v11  ;;  %v716_v58 = vadd.f32 %v3245_v45, %v607_v55 }
 0x374   :  { %v696_v47 = vpop.f32.mrf.mxu1 }
 0x375   :  { %v743_v48 = vadd.f32 %v696_v47, %v3746_v11  ;;  %753 = vrot.lane.b32.xlu0 %v744_v46, %s3639_s4  ;;  %v715_v61 = vadd.f32 %v696_v47, %v606_v57  ;;  %v2926_v63 = vmul.f32 -1.442695, %v716_v58 }
 0x377   :  { %v3248_v49 = vpop.f32.mrf.mxu1  ;;  %751 = vrot.lane.b32.xlu1 %v743_v48, %s3639_s4  ;;  %v2925_v3 = vmul.f32 -1.442695, %v715_v61  ;;  %3462 = vpow2.f32 %v2926_v63 }
 0x378   :  { %v746_v50 = vadd.f32 %v3248_v49, %v3746_v11  ;;  %v718_v2 = vadd.f32 %v3248_v49, %v609_v60 }
 0x379   :  { %v706_v51 = vpop.f32.mrf.mxu1  ;;  %3464 = vpow2.f32 %v2925_v3 }
 0x37a   :  { %v745_v52 = vadd.f32 %v706_v51, %v3746_v11  ;;  %757 = vrot.lane.b32.xlu0 %v746_v50, %s3639_s4  ;;  %v717_v4 = vadd.f32 %v706_v51, %v608_v62  ;;  %v2928_v5 = vmul.f32 -1.442695, %v718_v2  ;;  %v37_v50 = vld [vmem:[%s4484_s0 + $0x40] sm:$0xff]  ;;  %v38_v51 = vld [vmem:[%s4484_s0 + $0x48] sm:$0xff] }
 0x37b   :  { %3185 = vmatprep.mubr.msk.f32.mxu0 %vm62_vm1, %v37_v50 }
 0x37c   :  { %755 = vrot.lane.b32.xlu1 %v745_v52, %s3639_s4  ;;  %v2927_v7 = vmul.f32 -1.442695, %v717_v4  ;;  %3466 = vpow2.f32 %v2928_v5  ;;  %3186 = vmatmul.mubr.msk.f32.gmra.mxu0 %vm62_vm1, %v38_v51  ;;  %v39_v52 = vld [vmem:[%s4484_s0 + $0x50] sm:$0xff] }
 0x37d   :  { %3188 = vmatprep.mubr.msk.f32.mxu0 %vm62_vm1, %v39_v52 }
 0x37e   :  { %3468 = vpow2.f32 %v2927_v7 }
 0x380   :  { %3189 = vmatmul.mubr.msk.f32.gmra.mxu0 %vm62_vm1, %v40_v53 }
 0x384   :  { %v3463_v8 = vpop.eup %3462 }
 0x385   :  { %v732_v12 = vadd.f32 1.0, %v3463_v8 }
 0x386   :  { %v3465_v10 = vpop.eup %3464 }
 0x387   :  { %v731_v14 = vadd.f32 1.0, %v3465_v10  ;;  %3470 = vrcp.f32 %v732_v12 }
 0x389   :  { %v3467_v13 = vpop.eup %3466  ;;  %3472 = vrcp.f32 %v731_v14 }
 0x38a   :  { %v734_v16 = vadd.f32 1.0, %v3467_v13 }
 0x38b   :  { %v3469_v15 = vpop.eup %3468 }
 0x38c   :  { %v733_v17 = vadd.f32 1.0, %v3469_v15  ;;  %3474 = vrcp.f32 %v734_v16 }
 0x38e   :  { %3476 = vrcp.f32 %v733_v17 }
 0x394   :  { %v3471_v18 = vpop.eup %3470 }
 0x395   :  { %v792_v54 = vsub.f32 1.0, %v3471_v18  ;;  %v816_v56 = vmul.f32 %v3471_v18, %v3804_v25 }
 0x396   :  { %v3473_v21 = vpop.eup %3472 }
 0x397   :  { %v791_v58 = vsub.f32 1.0, %v3473_v21  ;;  %v815_v61 = vmul.f32 %v3473_v21, %v3806_v30 }
 0x399   :  { %v3475_v28 = vpop.eup %3474 }
 0x39a   :  { %v794_v63 = vsub.f32 1.0, %v3475_v28  ;;  %v818_v4 = vmul.f32 %v3475_v28, %v3812_v39 }
 0x39b   :  { %v3477_v33 = vpop.eup %3476 }
 0x39c   :  { %v793_v7 = vsub.f32 1.0, %v3477_v33  ;;  %v817_v30 = vmul.f32 %v3477_v33, %v3814_v40 }
 0x3e7   :  { %v754_v19 = vpop.permute.xlu0 %753 }
 0x3e8   :  { %v764_v20 = vmul.f32 %v3471_v18, %v754_v19 }
 0x3e9   :  { %v752_v24 = vpop.permute.xlu1 %751 }
 0x3ea   :  { %v763_v26 = vmul.f32 %v3473_v21, %v752_v24  ;;  %773 = vrot.lane.b32.xlu0 %v764_v20, %s3639_s4 }
 0x3ec   :  { %v758_v31 = vpop.permute.xlu0 %757  ;;  %771 = vrot.lane.b32.xlu1 %v763_v26, %s3639_s4 }
 0x3ed   :  { %v766_v32 = vmul.f32 %v3475_v28, %v758_v31 }
 0x3ee   :  { %v756_v34 = vpop.permute.xlu1 %755 }
 0x3ef   :  { %v765_v35 = vmul.f32 %v3477_v33, %v756_v34  ;;  %777 = vrot.lane.b32.xlu0 %v766_v32, %s3639_s4 }
 0x3f1   :  { %775 = vrot.lane.b32.xlu1 %v765_v35, %s3639_s4 }
 0x43c   :  { %v3187_v26 = vpop.f32.mrf.mxu0 }
 0x43d   :  { %v824_v31 = vadd.f32 %v3187_v26, %v3759_v22  ;;  %v44_v26 = vld [vmem:[%s4484_s0 + $0x78] sm:$0xff] }
 0x43e   :  { %v269_v28 = vpop.f32.mrf.mxu0 }
 0x43f   :  { %v823_v33 = vadd.f32 %v3764_v23, %v269_v28 }
 0x440   :  { %v3190_v32 = vpop.f32.mrf.mxu0 }
 0x442   :  { %v279_v35 = vpop.f32.mrf.mxu0 }
 0x45c   :  { %v774_v36 = vpop.permute.xlu0 %773 }
 0x45d   :  { %v784_v37 = vadd.f32 %v774_v36, %v607_v55  ;;  %v826_v36 = vadd.f32 %v3190_v32, %v3771_v27 }
 0x45e   :  { %v772_v38 = vpop.permute.xlu1 %771 }
 0x45f   :  { %3478 = vtanh.f32 %v784_v37  ;;  %v783_v41 = vadd.f32 %v772_v38, %v606_v57  ;;  %v825_v38 = vadd.f32 %v3776_v29, %v279_v35 }
 0x461   :  { %3480 = vtanh.f32 %v783_v41  ;;  %v778_v42 = vpop.permute.xlu0 %777 }
 0x462   :  { %v786_v43 = vadd.f32 %v778_v42, %v609_v60 }
 0x463   :  { %v776_v44 = vpop.permute.xlu1 %775 }
 0x464   :  { %3482 = vtanh.f32 %v786_v43  ;;  %v785_v45 = vadd.f32 %v776_v44, %v608_v62 }
 0x466   :  { %3484 = vtanh.f32 %v785_v45 }
 0x46c   :  { %v3479_v46 = vpop.eup %3478 }
 0x46d   :  { %801 = vrot.lane.b32.xlu0 %v3479_v46, %s3640_s10 }
 0x46e   :  { %v3481_v47 = vpop.eup %3480 }
 0x46f   :  { %799 = vrot.lane.b32.xlu1 %v3481_v47, %s3640_s10 }
 0x471   :  { %v3483_v48 = vpop.eup %3482 }
 0x472   :  { %805 = vrot.lane.b32.xlu0 %v3483_v48, %s3640_s10 }
 0x473   :  { %v3485_v49 = vpop.eup %3484 }
 0x474   :  { %803 = vrot.lane.b32.xlu1 %v3485_v49, %s3640_s10 }
 0x4df   :  { %v802_v55 = vpop.permute.xlu0 %801 }
 0x4e0   :  { %v812_v57 = vmul.f32 %v802_v55, %v792_v54 }
 0x4e1   :  { %v800_v59 = vpop.permute.xlu1 %799 }
 0x4e2   :  { %v3869_v60 = vadd.f32 %v816_v56, %v812_v57  ;;  %v811_v62 = vmul.f32 %v800_v59, %v791_v58 }
 0x4e4   :  { %v3872_v2 = vadd.f32 %v815_v61, %v811_v62  ;;  %v806_v3 = vpop.permute.xlu0 %805  ;;  %833 = vrot.lane.b32.xlu0 %v3869_v60, %s3640_s10 }
 0x4e5   :  { %v814_v5 = vmul.f32 %v806_v3, %v794_v63 }
 0x4e6   :  { %v804_v25 = vpop.permute.xlu1 %803  ;;  %831 = vrot.lane.b32.xlu1 %v3872_v2, %s3640_s10 }
 0x4e7   :  { %v3879_v8 = vadd.f32 %v818_v4, %v814_v5  ;;  %v813_v10 = vmul.f32 %v804_v25, %v793_v7 }
 0x4e9   :  { %v3882_v12 = vadd.f32 %v817_v30, %v813_v10  ;;  %837 = vrot.lane.b32.xlu0 %v3879_v8, %s3640_s10 }
 0x4eb   :  { %835 = vrot.lane.b32.xlu1 %v3882_v12, %s3640_s10 }
 0x556   :  { %v834_v39 = vpop.permute.xlu0 %833 }
 0x558   :  { %v832_v13 = vpop.permute.xlu1 %831 }
 0x559   :  { %3257 = vmatprep.mubr.msk.f32.mxu1 %vm401_vm2, %v832_v13 }
 0x55a   :  { %3258 = vmatmul.mubr.msk.f32.vlgmr.msra.gmra.mxu1 %vm401_vm2, %v834_v39 }
 0x55b   :  { %3264 = vmatpush3.msra.mxu1 %v3689_v0  ;;  %v838_v14 = vpop.permute.xlu0 %837 }
 0x55c   :  { %3265 = vmatprep.subr.mxu1 %v3694_v1 }
 0x55d   :  { %v836_v40 = vpop.permute.xlu1 %835  ;;  %3266 = vmatpush3.msra.mxu1 %v3694_v1 }
 0x55e   :  { %3260 = vmatprep.mubr.msk.f32.mxu1 %vm401_vm2, %v836_v40  ;;  %3267 = vmatprep.subr.mxu1 %v3710_v6 }
 0x55f   :  { %3261 = vmatmul.mubr.msk.f32.gmra.mxu1 %vm401_vm2, %v838_v14 }
 0x560   :  { %3268 = vmatpush3.msra.mxu1 %v3710_v6 }
 0x561   :  { %3269 = vmatprep.subr.mxu1 %v3725_v9 }
 0x562   :  { %3270 = vmatpush3.msra.mxu1 %v3725_v9 }
 0x563   :  { %3277 = vmatprep.subr.mxu1 %v3689_v0 }
 0x61a   :  { %v3259_v15 = vpop.f32.mrf.mxu1 }
 0x61b   :  { %v961_v16 = vadd.f32 %v3259_v15, %v3746_v11  ;;  %v933_v34 = vadd.f32 %v3259_v15, %v824_v31 }
 0x61c   :  { %v913_v17 = vpop.f32.mrf.mxu1 }
 0x61d   :  { %v960_v18 = vadd.f32 %v913_v17, %v3746_v11  ;;  %970 = vrot.lane.b32.xlu0 %v961_v16, %s3639_s4  ;;  %v932_v37 = vadd.f32 %v913_v17, %v823_v33  ;;  %v2934_v41 = vmul.f32 -1.442695, %v933_v34 }
 0x61f   :  { %v3262_v19 = vpop.f32.mrf.mxu1  ;;  %968 = vrot.lane.b32.xlu1 %v960_v18, %s3639_s4  ;;  %v2933_v43 = vmul.f32 -1.442695, %v932_v37  ;;  %3486 = vpow2.f32 %v2934_v41 }
 0x620   :  { %v963_v20 = vadd.f32 %v3262_v19, %v3746_v11  ;;  %v935_v42 = vadd.f32 %v3262_v19, %v826_v36 }
 0x621   :  { %v923_v21 = vpop.f32.mrf.mxu1  ;;  %3488 = vpow2.f32 %v2933_v43 }
 0x622   :  { %v962_v24 = vadd.f32 %v923_v21, %v3746_v11  ;;  %974 = vrot.lane.b32.xlu0 %v963_v20, %s3639_s4  ;;  %v934_v44 = vadd.f32 %v923_v21, %v825_v38  ;;  %v2936_v45 = vmul.f32 -1.442695, %v935_v42  ;;  %v41_v20 = vld [vmem:[%s4484_s0 + $0x60] sm:$0xff]  ;;  %v42_v21 = vld [vmem:[%s4484_s0 + $0x68] sm:$0xff] }
 0x623   :  { %3191 = vmatprep.mubr.msk.f32.mxu0 %vm62_vm1, %v41_v20 }
 0x624   :  { %972 = vrot.lane.b32.xlu1 %v962_v24, %s3639_s4  ;;  %v2935_v46 = vmul.f32 -1.442695, %v934_v44  ;;  %3490 = vpow2.f32 %v2936_v45  ;;  %3192 = vmatmul.mubr.msk.f32.gmra.mxu0 %vm62_vm1, %v42_v21  ;;  %v43_v24 = vld [vmem:[%s4484_s0 + $0x70] sm:$0xff] }
 0x625   :  { %3194 = vmatprep.mubr.msk.f32.mxu0 %vm62_vm1, %v43_v24 }
 0x626   :  { %3492 = vpow2.f32 %v2935_v46 }
 0x628   :  { %3195 = vmatmul.mubr.msk.f32.gmra.mxu0 %vm62_vm1, %v44_v26 }
 0x62c   :  { %v3487_v47 = vpop.eup %3486 }
 0x62d   :  { %v949_v49 = vadd.f32 1.0, %v3487_v47 }
 0x62e   :  { %v3489_v48 = vpop.eup %3488 }
 0x62f   :  { %v948_v51 = vadd.f32 1.0, %v3489_v48  ;;  %3494 = vrcp.f32 %v949_v49 }
 0x631   :  { %v3491_v50 = vpop.eup %3490  ;;  %3496 = vrcp.f32 %v948_v51 }
 0x632   :  { %v951_v53 = vadd.f32 1.0, %v3491_v50 }
 0x633   :  { %v3493_v52 = vpop.eup %3492 }
 0x634   :  { %v950_v54 = vadd.f32 1.0, %v3493_v52  ;;  %3498 = vrcp.f32 %v951_v53 }
 0x636   :  { %3500 = vrcp.f32 %v950_v54 }
 0x63c   :  { %v3495_v55 = vpop.eup %3494 }
 0x63d   :  { %v1009_v28 = vsub.f32 1.0, %v3495_v55  ;;  %v1033_v32 = vmul.f32 %v3495_v55, %v3869_v60 }
 0x63e   :  { %v3497_v58 = vpop.eup %3496 }
 0x63f   :  { %v1008_v34 = vsub.f32 1.0, %v3497_v58  ;;  %v1032_v37 = vmul.f32 %v3497_v58, %v3872_v2 }
 0x641   :  { %v3499_v62 = vpop.eup %3498 }
 0x642   :  { %v1011_v41 = vsub.f32 1.0, %v3499_v62  ;;  %v1035_v44 = vmul.f32 %v3499_v62, %v3879_v8 }
 0x643   :  { %v3501_v4 = vpop.eup %3500 }
 0x644   :  { %v1010_v46 = vsub.f32 1.0, %v3501_v4  ;;  %v1034_v2 = vmul.f32 %v3501_v4, %v3882_v12 }
 0x68f   :  { %v971_v56 = vpop.permute.xlu0 %970 }
 0x690   :  { %v981_v57 = vmul.f32 %v3495_v55, %v971_v56 }
 0x691   :  { %v969_v59 = vpop.permute.xlu1 %968 }
 0x692   :  { %v980_v61 = vmul.f32 %v3497_v58, %v969_v59  ;;  %990 = vrot.lane.b32.xlu0 %v981_v57, %s3639_s4 }
 0x694   :  { %v975_v63 = vpop.permute.xlu0 %974  ;;  %988 = vrot.lane.b32.xlu1 %v980_v61, %s3639_s4 }
 0x695   :  { %v983_v3 = vmul.f32 %v3499_v62, %v975_v63 }
 0x696   :  { %v973_v5 = vpop.permute.xlu1 %972 }
 0x697   :  { %v982_v7 = vmul.f32 %v3501_v4, %v973_v5  ;;  %994 = vrot.lane.b32.xlu0 %v983_v3, %s3639_s4 }
 0x699   :  { %992 = vrot.lane.b32.xlu1 %v982_v7, %s3639_s4 }
 0x704   :  { %v991_v25 = vpop.permute.xlu0 %990 }
 0x705   :  { %v1001_v30 = vadd.f32 %v991_v25, %v824_v31 }
 0x706   :  { %v989_v10 = vpop.permute.xlu1 %988 }
 0x707   :  { %3502 = vtanh.f32 %v1001_v30  ;;  %v1000_v39 = vadd.f32 %v989_v10, %v823_v33 }
 0x709   :  { %3504 = vtanh.f32 %v1000_v39  ;;  %v995_v13 = vpop.permute.xlu0 %994 }
 0x70a   :  { %v1003_v40 = vadd.f32 %v995_v13, %v826_v36 }
 0x70b   :  { %v993_v14 = vpop.permute.xlu1 %992 }
 0x70c   :  { %3506 = vtanh.f32 %v1003_v40  ;;  %v1002_v15 = vadd.f32 %v993_v14, %v825_v38 }
 0x70e   :  { %3508 = vtanh.f32 %v1002_v15 }
 0x714   :  { %v3503_v16 = vpop.eup %3502 }
 0x715   :  { %1018 = vrot.lane.b32.xlu0 %v3503_v16, %s3640_s10 }
 0x716   :  { %v3505_v17 = vpop.eup %3504 }
 0x717   :  { %1016 = vrot.lane.b32.xlu1 %v3505_v17, %s3640_s10 }
 0x719   :  { %v3507_v18 = vpop.eup %3506 }
 0x71a   :  { %1022 = vrot.lane.b32.xlu0 %v3507_v18, %s3640_s10 }
 0x71b   :  { %v3509_v19 = vpop.eup %3508 }
 0x71c   :  { %1020 = vrot.lane.b32.xlu1 %v3509_v19, %s3640_s10 }
 0x787   :  { %v1019_v31 = vpop.permute.xlu0 %1018 }
 0x788   :  { %v1029_v33 = vmul.f32 %v1019_v31, %v1009_v28 }
 0x789   :  { %v1017_v35 = vpop.permute.xlu1 %1016 }
 0x78a   :  { %v3937_v36 = vadd.f32 %v1033_v32, %v1029_v33  ;;  %v1028_v38 = vmul.f32 %v1017_v35, %v1008_v34 }
 0x78c   :  { %v3940_v42 = vadd.f32 %v1032_v37, %v1028_v38  ;;  %v1023_v43 = vpop.permute.xlu0 %1022  ;;  %1050 = vrot.lane.b32.xlu0 %v3937_v36, %s3640_s10 }
 0x78d   :  { %v1031_v45 = vmul.f32 %v1023_v43, %v1011_v41 }
 0x78e   :  { %v1021_v60 = vpop.permute.xlu1 %1020  ;;  %1048 = vrot.lane.b32.xlu1 %v3940_v42, %s3640_s10 }
 0x78f   :  { %v3947_v47 = vadd.f32 %v1035_v44, %v1031_v45  ;;  %v1030_v48 = vmul.f32 %v1021_v60, %v1010_v46 }
 0x791   :  { %v3950_v49 = vadd.f32 %v1034_v2, %v1030_v48  ;;  %1054 = vrot.lane.b32.xlu0 %v3947_v47, %s3640_s10 }
 0x793   :  { %1052 = vrot.lane.b32.xlu1 %v3950_v49, %s3640_s10 }
 0x7fe   :  { %v1051_v8 = vpop.permute.xlu0 %1050 }
 0x800   :  { %v1049_v50 = vpop.permute.xlu1 %1048 }
 0x801   :  { %3271 = vmatprep.mubr.msk.f32.mxu1 %vm401_vm2, %v1049_v50  ;;  %v45_v50 = vld [vmem:[%s4484_s0 + $0x80] sm:$0xff] }
 0x802   :  { %3272 = vmatmul.mubr.msk.f32.vlgmr.msra.gmra.mxu1 %vm401_vm2, %v1051_v8  ;;  %3197 = vmatprep.mubr.msk.f32.mxu0 %vm62_vm1, %v45_v50 }
 0x803   :  { %3278 = vmatpush3.msra.mxu1 %v3689_v0  ;;  %v1055_v51 = vpop.permute.xlu0 %1054 }
 0x804   :  { %3279 = vmatprep.subr.mxu1 %v3694_v1 }
 0x805   :  { %v1053_v12 = vpop.permute.xlu1 %1052  ;;  %3280 = vmatpush3.msra.mxu1 %v3694_v1 }
 0x806   :  { %3274 = vmatprep.mubr.msk.f32.mxu1 %vm401_vm2, %v1053_v12  ;;  %3281 = vmatprep.subr.mxu1 %v3710_v6  ;;  %v46_v12 = vld [vmem:[%s4484_s0 + $0x88] sm:$0xff] }
 0x807   :  { %3275 = vmatmul.mubr.msk.f32.gmra.mxu1 %vm401_vm2, %v1055_v51  ;;  %3198 = vmatmul.mubr.msk.f32.gmra.mxu0 %vm62_vm1, %v46_v12  ;;  %v47_v51 = vld [vmem:[%s4484_s0 + $0x90] sm:$0xff] }
 0x808   :  { %3282 = vmatpush3.msra.mxu1 %v3710_v6  ;;  %3200 = vmatprep.mubr.msk.f32.mxu0 %vm62_vm1, %v47_v51 }
 0x809   :  { %3283 = vmatprep.subr.mxu1 %v3725_v9 }
 0x80a   :  { %3284 = vmatpush3.msra.mxu1 %v3725_v9 }
 0x80b   :  { %3291 = vmatprep.subr.mxu1 %v3689_v0  ;;  %v3193_v0 = vpop.f32.mrf.mxu0 }
 0x80c   :  { %v1041_v58 = vadd.f32 %v3193_v0, %v3759_v22 }
 0x80d   :  { %v289_v9 = vpop.f32.mrf.mxu0 }
 0x80e   :  { %v1040_v61 = vadd.f32 %v3764_v23, %v289_v9 }
 0x80f   :  { %v3196_v59 = vpop.f32.mrf.mxu0 }
 0x810   :  { %v1043_v3 = vadd.f32 %v3196_v59, %v3771_v27 }
 0x811   :  { %v299_v63 = vpop.f32.mrf.mxu0 }
 0x812   :  { %v1042_v5 = vadd.f32 %v3776_v29, %v299_v63 }
 0x8c2   :  { %v3273_v52 = vpop.f32.mrf.mxu1 }
 0x8c3   :  { %v1178_v53 = vadd.f32 %v3273_v52, %v3746_v11  ;;  %v1150_v62 = vadd.f32 %v3273_v52, %v1041_v58  ;;  %v48_v52 = vld [vmem:[%s4484_s0 + $0x98] sm:$0xff] }
 0x8c4   :  { %v1130_v54 = vpop.f32.mrf.mxu1  ;;  %3201 = vmatmul.mubr.msk.f32.gmra.mxu0 %vm62_vm1, %v48_v52 }
 0x8c5   :  { %v1177_v1 = vadd.f32 %v1130_v54, %v3746_v11  ;;  %1187 = vrot.lane.b32.xlu0 %v1178_v53, %s3639_s4  ;;  %v1149_v4 = vadd.f32 %v1130_v54, %v1040_v61  ;;  %v2942_v7 = vmul.f32 -1.442695, %v1150_v62 }
 0x8c7   :  { %v3276_v55 = vpop.f32.mrf.mxu1  ;;  %1185 = vrot.lane.b32.xlu1 %v1177_v1, %s3639_s4  ;;  %v2941_v30 = vmul.f32 -1.442695, %v1149_v4  ;;  %3510 = vpow2.f32 %v2942_v7 }
 0x8c8   :  { %v1180_v56 = vadd.f32 %v3276_v55, %v3746_v11  ;;  %v1152_v25 = vadd.f32 %v3276_v55, %v1043_v3 }
 0x8c9   :  { %v1140_v6 = vpop.f32.mrf.mxu1  ;;  %3512 = vpow2.f32 %v2941_v30  ;;  %v4029_v30 = vld [vmem:[%s4482_s3 + $0x18] sm:$0xff] }
 0x8ca   :  { %v1179_v57 = vadd.f32 %v1140_v6, %v3746_v11  ;;  %1191 = vrot.lane.b32.xlu0 %v1180_v56, %s3639_s4  ;;  %v1151_v10 = vadd.f32 %v1140_v6, %v1042_v5  ;;  %v2944_v39 = vmul.f32 -1.442695, %v1152_v25 }
 0x8cc   :  { %1189 = vrot.lane.b32.xlu1 %v1179_v57, %s3639_s4  ;;  %v2943_v13 = vmul.f32 -1.442695, %v1151_v10  ;;  %3514 = vpow2.f32 %v2944_v39 }
 0x8ce   :  { %3516 = vpow2.f32 %v2943_v13  ;;  %v4043_v13 = vld [vmem:[%s4482_s3 + $0x8] sm:$0xff] }
 0x8d4   :  { %v3511_v22 = vpop.eup %3510 }
 0x8d5   :  { %v1166_v23 = vadd.f32 1.0, %v3511_v22  ;;  %v4051_v22 = vld [vmem:[%s4482_s3] sm:$0xff] }
 0x8d6   :  { %v3513_v40 = vpop.eup %3512 }
 0x8d7   :  { %v1165_v15 = vadd.f32 1.0, %v3513_v40  ;;  %3518 = vrcp.f32 %v1166_v23 }
 0x8d9   :  { %v3515_v14 = vpop.eup %3514  ;;  %3520 = vrcp.f32 %v1165_v15 }
 0x8da   :  { %v1168_v27 = vadd.f32 1.0, %v3515_v14 }
 0x8db   :  { %v3517_v16 = vpop.eup %3516 }
 0x8dc   :  { %v1167_v29 = vadd.f32 1.0, %v3517_v16  ;;  %3522 = vrcp.f32 %v1168_v27 }
 0x8de   :  { %3524 = vrcp.f32 %v1167_v29 }
 0x8e4   :  { %v3519_v17 = vpop.eup %3518 }
 0x8e5   :  { %v1226_v53 = vsub.f32 1.0, %v3519_v17  ;;  %v1250_v1 = vmul.f32 %v3519_v17, %v3937_v36 }
 0x8e6   :  { %v3521_v20 = vpop.eup %3520 }
 0x8e7   :  { %v1225_v56 = vsub.f32 1.0, %v3521_v20  ;;  %v1249_v0 = vmul.f32 %v3521_v20, %v3940_v42 }
 0x8e9   :  { %v3523_v26 = vpop.eup %3522 }
 0x8ea   :  { %v1252_v62 = vmul.f32 %v3523_v26, %v3947_v47 }
 0x8eb   :  { %v3525_v32 = vpop.eup %3524 }
 0x8ec   :  { %v1251_v42 = vmul.f32 %v3525_v32, %v3950_v49  ;;  %v4035_v49 = vld [vmem:[%s4482_s3 + $0x10] sm:$0xff] }
 0x937   :  { %v1188_v18 = vpop.permute.xlu0 %1187 }
 0x938   :  { %v1198_v19 = vmul.f32 %v3519_v17, %v1188_v18  ;;  %v3199_v18 = vpop.f32.mrf.mxu0 }
 0x939   :  { %v1186_v21 = vpop.permute.xlu1 %1185 }
 0x93a   :  { %v1197_v24 = vmul.f32 %v3521_v20, %v1186_v21  ;;  %1207 = vrot.lane.b32.xlu0 %v1198_v19, %s3639_s4  ;;  %v309_v19 = vpop.f32.mrf.mxu0  ;;  %v4067_v20 = vld [vmem:[%s4486_s2 + $0x8] sm:$0xff] }
 0x93b   :  { %v1258_v21 = vadd.f32 %v4067_v20, %v3199_v18  ;;  %v52_v18 = vld [vmem:[%s4484_s0 + $0xb8] sm:$0xff] }
 0x93c   :  { %v1192_v28 = vpop.permute.xlu0 %1191  ;;  %1205 = vrot.lane.b32.xlu1 %v1197_v24, %s3639_s4 }
 0x93d   :  { %v1200_v31 = vmul.f32 %v3523_v26, %v1192_v28 }
 0x93e   :  { %v1190_v33 = vpop.permute.xlu1 %1189 }
 0x93f   :  { %v1199_v34 = vmul.f32 %v3525_v32, %v1190_v33  ;;  %1211 = vrot.lane.b32.xlu0 %v1200_v31, %s3639_s4  ;;  %v4079_v33 = vld [vmem:[%s4486_s2 + $0x18] sm:$0xff] }
 0x941   :  { %1209 = vrot.lane.b32.xlu1 %v1199_v34, %s3639_s4 }
 0x984   :  { %v3202_v24 = vpop.f32.mrf.mxu0 }
 0x985   :  { %v1260_v34 = vadd.f32 %v4079_v33, %v3202_v24 }
 0x9ac   :  { %v1208_v35 = vpop.permute.xlu0 %1207 }
 0x9ad   :  { %v1218_v37 = vadd.f32 %v1208_v35, %v1041_v58  ;;  %v1228_v58 = vsub.f32 1.0, %v3523_v26  ;;  %v4073_v26 = vld [vmem:[%s4486_s2] sm:$0xff] }
 0x9ae   :  { %v1206_v38 = vpop.permute.xlu1 %1205  ;;  %v1257_v28 = vadd.f32 %v4073_v26, %v309_v19 }
 0x9af   :  { %3526 = vtanh.f32 %v1218_v37  ;;  %v1217_v41 = vadd.f32 %v1206_v38, %v1040_v61  ;;  %v4085_v37 = vld [vmem:[%s4486_s2 + $0x10] sm:$0xff] }
 0x9b1   :  { %3528 = vtanh.f32 %v1217_v41  ;;  %v1212_v43 = vpop.permute.xlu0 %1211 }
 0x9b2   :  { %v1220_v44 = vadd.f32 %v1212_v43, %v1043_v3  ;;  %v1227_v3 = vsub.f32 1.0, %v3525_v32  ;;  %v319_v32 = vpop.f32.mrf.mxu0 }
 0x9b3   :  { %v1210_v45 = vpop.permute.xlu1 %1209  ;;  %v1259_v38 = vadd.f32 %v4085_v37, %v319_v32 }
 0x9b4   :  { %3530 = vtanh.f32 %v1220_v44  ;;  %v1219_v46 = vadd.f32 %v1210_v45, %v1042_v5 }
 0x9b6   :  { %3532 = vtanh.f32 %v1219_v46 }
 0x9bc   :  { %v3527_v60 = vpop.eup %3526 }
 0x9bd   :  { %1235 = vrot.lane.b32.xlu0 %v3527_v60, %s3640_s10 }
 0x9be   :  { %v3529_v2 = vpop.eup %3528 }
 0x9bf   :  { %1233 = vrot.lane.b32.xlu1 %v3529_v2, %s3640_s10 }
 0x9c1   :  { %v3531_v48 = vpop.eup %3530 }
 0x9c2   :  { %1239 = vrot.lane.b32.xlu0 %v3531_v48, %s3640_s10 }
 0x9c3   :  { %v3533_v8 = vpop.eup %3532 }
 0x9c4   :  { %1237 = vrot.lane.b32.xlu1 %v3533_v8, %s3640_s10 }
 0xa2f   :  { %v1236_v54 = vpop.permute.xlu0 %1235 }
 0xa30   :  { %v1246_v55 = vmul.f32 %v1236_v54, %v1226_v53 }
 0xa31   :  { %v1234_v6 = vpop.permute.xlu1 %1233 }
 0xa32   :  { %v4005_v57 = vadd.f32 %v1250_v1, %v1246_v55  ;;  %v1245_v9 = vmul.f32 %v1234_v6, %v1225_v56 }
 0xa34   :  { %v4008_v59 = vadd.f32 %v1249_v0, %v1245_v9  ;;  %v1240_v61 = vpop.permute.xlu0 %1239  ;;  %1267 = vrot.lane.b32.xlu0 %v4005_v57, %s3640_s10 }
 0xa35   :  { %v1248_v63 = vmul.f32 %v1240_v61, %v1228_v58 }
 0xa36   :  { %v1238_v36 = vpop.permute.xlu1 %1237  ;;  %1265 = vrot.lane.b32.xlu1 %v4008_v59, %s3640_s10 }
 0xa37   :  { %v4015_v4 = vadd.f32 %v1252_v62, %v1248_v63  ;;  %v1247_v5 = vmul.f32 %v1238_v36, %v1227_v3 }
 0xa39   :  { %v4018_v7 = vadd.f32 %v1251_v42, %v1247_v5  ;;  %1271 = vrot.lane.b32.xlu0 %v4015_v4, %s3640_s10 }
 0xa3b   :  { %1269 = vrot.lane.b32.xlu1 %v4018_v7, %s3640_s10 }
 0xaa6   :  { %v1268_v47 = vpop.permute.xlu0 %1267 }
 0xaa8   :  { %v1266_v25 = vpop.permute.xlu1 %1265 }
 0xaa9   :  { %3285 = vmatprep.mubr.msk.f32.mxu1 %vm401_vm2, %v1266_v25 }
 0xaaa   :  { %3286 = vmatmul.mubr.msk.f32.vlgmr.msra.gmra.mxu1 %vm401_vm2, %v1268_v47 }
 0xaab   :  { %3292 = vmatpush3.msra.mxu1 %v4029_v30  ;;  %v1272_v39 = vpop.permute.xlu0 %1271 }
 0xaac   :  { %3293 = vmatprep.subr.mxu1 %v4035_v49 }
 0xaad   :  { %v1270_v10 = vpop.permute.xlu1 %1269  ;;  %3294 = vmatpush3.msra.mxu1 %v4035_v49 }
 0xaae   :  { %3288 = vmatprep.mubr.msk.f32.mxu1 %vm401_vm2, %v1270_v10  ;;  %3295 = vmatprep.subr.mxu1 %v4043_v13 }
 0xaaf   :  { %3289 = vmatmul.mubr.msk.f32.gmra.mxu1 %vm401_vm2, %v1272_v39 }
 0xab0   :  { %3296 = vmatpush3.msra.mxu1 %v4043_v13 }
 0xab1   :  { %3297 = vmatprep.subr.mxu1 %v4051_v22 }
 0xab2   :  { %3298 = vmatpush3.msra.mxu1 %v4051_v22 }
 0xab3   :  { %3305 = vmatprep.subr.mxu1 %v4029_v30 }
 0xb6a   :  { %v3287_v40 = vpop.f32.mrf.mxu1 }
 0xb6b   :  { %v1395_v23 = vadd.f32 %v3287_v40, %v3746_v11  ;;  %v1367_v31 = vadd.f32 %v3287_v40, %v1258_v21 }
 0xb6c   :  { %v1347_v14 = vpop.f32.mrf.mxu1 }
 0xb6d   :  { %v1394_v15 = vadd.f32 %v1347_v14, %v3746_v11  ;;  %1404 = vrot.lane.b32.xlu0 %v1395_v23, %s3639_s4  ;;  %v1366_v35 = vadd.f32 %v1347_v14, %v1257_v28  ;;  %v2950_v41 = vmul.f32 -1.442695, %v1367_v31 }
 0xb6f   :  { %v3290_v16 = vpop.f32.mrf.mxu1  ;;  %1402 = vrot.lane.b32.xlu1 %v1394_v15, %s3639_s4  ;;  %v2949_v44 = vmul.f32 -1.442695, %v1366_v35  ;;  %3534 = vpow2.f32 %v2950_v41 }
 0xb70   :  { %v1397_v27 = vadd.f32 %v3290_v16, %v3746_v11  ;;  %v1369_v43 = vadd.f32 %v3290_v16, %v1260_v34 }
 0xb71   :  { %v1357_v29 = vpop.f32.mrf.mxu1  ;;  %3536 = vpow2.f32 %v2949_v44 }
 0xb72   :  { %v1396_v17 = vadd.f32 %v1357_v29, %v3746_v11  ;;  %1408 = vrot.lane.b32.xlu0 %v1397_v27, %s3639_s4  ;;  %v1368_v45 = vadd.f32 %v1357_v29, %v1259_v38  ;;  %v2952_v46 = vmul.f32 -1.442695, %v1369_v43  ;;  %v49_v27 = vld [vmem:[%s4484_s0 + $0xa0] sm:$0xff]  ;;  %v50_v29 = vld [vmem:[%s4484_s0 + $0xa8] sm:$0xff] }
 0xb73   :  { %3203 = vmatprep.mubr.msk.f32.mxu0 %vm62_vm1, %v49_v27 }
 0xb74   :  { %1406 = vrot.lane.b32.xlu1 %v1396_v17, %s3639_s4  ;;  %v2951_v60 = vmul.f32 -1.442695, %v1368_v45  ;;  %3538 = vpow2.f32 %v2952_v46  ;;  %3204 = vmatmul.mubr.msk.f32.gmra.mxu0 %vm62_vm1, %v50_v29  ;;  %v51_v17 = vld [vmem:[%s4484_s0 + $0xb0] sm:$0xff] }
 0xb75   :  { %3206 = vmatprep.mubr.msk.f32.mxu0 %vm62_vm1, %v51_v17 }
 0xb76   :  { %3540 = vpow2.f32 %v2951_v60 }
 0xb78   :  { %3207 = vmatmul.mubr.msk.f32.gmra.mxu0 %vm62_vm1, %v52_v18 }
 0xb7c   :  { %v3535_v2 = vpop.eup %3534 }
 0xb7d   :  { %v1383_v8 = vadd.f32 1.0, %v3535_v2 }
 0xb7e   :  { %v3537_v48 = vpop.eup %3536 }
 0xb7f   :  { %v1382_v12 = vadd.f32 1.0, %v3537_v48  ;;  %3542 = vrcp.f32 %v1383_v8 }
 0xb81   :  { %v3539_v50 = vpop.eup %3538  ;;  %3544 = vrcp.f32 %v1382_v12 }
 0xb82   :  { %v1385_v52 = vadd.f32 1.0, %v3539_v50 }
 0xb83   :  { %v3541_v51 = vpop.eup %3540 }
 0xb84   :  { %v1384_v53 = vadd.f32 1.0, %v3541_v51  ;;  %3546 = vrcp.f32 %v1385_v52 }
 0xb86   :  { %3548 = vrcp.f32 %v1384_v53 }
 0xb8c   :  { %v3543_v54 = vpop.eup %3542 }
 0xb8d   :  { %v1443_v19 = vsub.f32 1.0, %v3543_v54  ;;  %v1467_v24 = vmul.f32 %v3543_v54, %v4005_v57 }
 0xb8e   :  { %v3545_v56 = vpop.eup %3544 }
 0xb8f   :  { %v1442_v31 = vsub.f32 1.0, %v3545_v56  ;;  %v1466_v35 = vmul.f32 %v3545_v56, %v4008_v59 }
 0xb91   :  { %v3547_v9 = vpop.eup %3546 }
 0xb92   :  { %v1445_v41 = vsub.f32 1.0, %v3547_v9  ;;  %v1469_v45 = vmul.f32 %v3547_v9, %v4015_v4 }
 0xb93   :  { %v3549_v62 = vpop.eup %3548 }
 0xb94   :  { %v1444_v60 = vsub.f32 1.0, %v3549_v62  ;;  %v1468_v59 = vmul.f32 %v3549_v62, %v4018_v7 }
 0xbdf   :  { %v1405_v1 = vpop.permute.xlu0 %1404 }
 0xbe0   :  { %v1415_v55 = vmul.f32 %v3543_v54, %v1405_v1 }
 0xbe1   :  { %v1403_v6 = vpop.permute.xlu1 %1402 }
 0xbe2   :  { %v1414_v0 = vmul.f32 %v3545_v56, %v1403_v6  ;;  %1424 = vrot.lane.b32.xlu0 %v1415_v55, %s3639_s4 }
 0xbe4   :  { %v1409_v58 = vpop.permute.xlu0 %1408  ;;  %1422 = vrot.lane.b32.xlu1 %v1414_v0, %s3639_s4 }
 0xbe5   :  { %v1417_v61 = vmul.f32 %v3547_v9, %v1409_v58 }
 0xbe6   :  { %v1407_v63 = vpop.permute.xlu1 %1406 }
 0xbe7   :  { %v1416_v3 = vmul.f32 %v3549_v62, %v1407_v63  ;;  %1428 = vrot.lane.b32.xlu0 %v1417_v61, %s3639_s4 }
 0xbe9   :  { %1426 = vrot.lane.b32.xlu1 %v1416_v3, %s3639_s4 }
 0xc34   :  { %v3205_v0 = vpop.f32.mrf.mxu0 }
 0xc35   :  { %v1475_v58 = vadd.f32 %v4067_v20, %v3205_v0  ;;  %v56_v0 = vld [vmem:[%s4484_s0 + $0xd8] sm:$0xff] }
 0xc36   :  { %v329_v9 = vpop.f32.mrf.mxu0 }
 0xc37   :  { %v1474_v62 = vadd.f32 %v4073_v26, %v329_v9 }
 0xc38   :  { %v3208_v61 = vpop.f32.mrf.mxu0 }
 0xc3a   :  { %v339_v3 = vpop.f32.mrf.mxu0 }
 0xc54   :  { %v1425_v36 = vpop.permute.xlu0 %1424 }
 0xc55   :  { %v1435_v42 = vadd.f32 %v1425_v36, %v1258_v21  ;;  %v1477_v36 = vadd.f32 %v4079_v33, %v3208_v61 }
 0xc56   :  { %v1423_v5 = vpop.permute.xlu1 %1422 }
 0xc57   :  { %3550 = vtanh.f32 %v1435_v42  ;;  %v1434_v47 = vadd.f32 %v1423_v5, %v1257_v28  ;;  %v1476_v5 = vadd.f32 %v4085_v37, %v339_v3 }
 0xc59   :  { %3552 = vtanh.f32 %v1434_v47  ;;  %v1429_v25 = vpop.permute.xlu0 %1428 }
 0xc5a   :  { %v1437_v10 = vadd.f32 %v1429_v25, %v1260_v34 }
 0xc5b   :  { %v1427_v39 = vpop.permute.xlu1 %1426 }
 0xc5c   :  { %3554 = vtanh.f32 %v1437_v10  ;;  %v1436_v40 = vadd.f32 %v1427_v39, %v1259_v38 }
 0xc5e   :  { %3556 = vtanh.f32 %v1436_v40 }
 0xc64   :  { %v3551_v23 = vpop.eup %3550 }
 0xc65   :  { %1452 = vrot.lane.b32.xlu0 %v3551_v23, %s3640_s10 }
 0xc66   :  { %v3553_v14 = vpop.eup %3552 }
 0xc67   :  { %1450 = vrot.lane.b32.xlu1 %v3553_v14, %s3640_s10 }
 0xc69   :  { %v3555_v15 = vpop.eup %3554 }
 0xc6a   :  { %1456 = vrot.lane.b32.xlu0 %v3555_v15, %s3640_s10 }
 0xc6b   :  { %v3557_v16 = vpop.eup %3556 }
 0xc6c   :  { %1454 = vrot.lane.b32.xlu1 %v3557_v16, %s3640_s10 }
 0xcd7   :  { %v1453_v21 = vpop.permute.xlu0 %1452 }
 0xcd8   :  { %v1463_v28 = vmul.f32 %v1453_v21, %v1443_v19 }
 0xcd9   :  { %v1451_v32 = vpop.permute.xlu1 %1450 }
 0xcda   :  { %v4113_v34 = vadd.f32 %v1467_v24, %v1463_v28  ;;  %v1462_v38 = vmul.f32 %v1451_v32, %v1442_v31 }
 0xcdc   :  { %v4116_v43 = vadd.f32 %v1466_v35, %v1462_v38  ;;  %v1457_v44 = vpop.permute.xlu0 %1456  ;;  %1484 = vrot.lane.b32.xlu0 %v4113_v34, %s3640_s10 }
 0xcdd   :  { %v1465_v46 = vmul.f32 %v1457_v44, %v1445_v41 }
 0xcde   :  { %v1455_v57 = vpop.permute.xlu1 %1454  ;;  %1482 = vrot.lane.b32.xlu1 %v4116_v43, %s3640_s10 }
 0xcdf   :  { %v4123_v2 = vadd.f32 %v1469_v45, %v1465_v46  ;;  %v1464_v48 = vmul.f32 %v1455_v57, %v1444_v60 }
 0xce1   :  { %v4126_v8 = vadd.f32 %v1468_v59, %v1464_v48  ;;  %1488 = vrot.lane.b32.xlu0 %v4123_v2, %s3640_s10 }
 0xce3   :  { %1486 = vrot.lane.b32.xlu1 %v4126_v8, %s3640_s10 }
 0xd4e   :  { %v1485_v4 = vpop.permute.xlu0 %1484 }
 0xd50   :  { %v1483_v50 = vpop.permute.xlu1 %1482 }
 0xd51   :  { %3299 = vmatprep.mubr.msk.f32.mxu1 %vm401_vm2, %v1483_v50 }
 0xd52   :  { %3300 = vmatmul.mubr.msk.f32.vlgmr.msra.gmra.mxu1 %vm401_vm2, %v1485_v4 }
 0xd53   :  { %3306 = vmatpush3.msra.mxu1 %v4029_v30  ;;  %v1489_v12 = vpop.permute.xlu0 %1488 }
 0xd54   :  { %3307 = vmatprep.subr.mxu1 %v4035_v49 }
 0xd55   :  { %v1487_v7 = vpop.permute.xlu1 %1486  ;;  %3308 = vmatpush3.msra.mxu1 %v4035_v49 }
 0xd56   :  { %3302 = vmatprep.mubr.msk.f32.mxu1 %vm401_vm2, %v1487_v7  ;;  %3309 = vmatprep.subr.mxu1 %v4043_v13 }
 0xd57   :  { %3303 = vmatmul.mubr.msk.f32.gmra.mxu1 %vm401_vm2, %v1489_v12 }
 0xd58   :  { %3310 = vmatpush3.msra.mxu1 %v4043_v13 }
 0xd59   :  { %3311 = vmatprep.subr.mxu1 %v4051_v22 }
 0xd5a   :  { %3312 = vmatpush3.msra.mxu1 %v4051_v22 }
 0xd5b   :  { %3319 = vmatprep.subr.mxu1 %v4029_v30 }
 0xe12   :  { %v3301_v51 = vpop.f32.mrf.mxu1 }
 0xe13   :  { %v1612_v52 = vadd.f32 %v3301_v51, %v3746_v11  ;;  %v1584_v63 = vadd.f32 %v3301_v51, %v1475_v58 }
 0xe14   :  { %v1564_v53 = vpop.f32.mrf.mxu1 }
 0xe15   :  { %v1611_v54 = vadd.f32 %v1564_v53, %v3746_v11  ;;  %1621 = vrot.lane.b32.xlu0 %v1612_v52, %s3639_s4  ;;  %v1583_v42 = vadd.f32 %v1564_v53, %v1474_v62  ;;  %v2958_v47 = vmul.f32 -1.442695, %v1584_v63 }
 0xe17   :  { %v3304_v1 = vpop.f32.mrf.mxu1  ;;  %1619 = vrot.lane.b32.xlu1 %v1611_v54, %s3639_s4  ;;  %v2957_v10 = vmul.f32 -1.442695, %v1583_v42  ;;  %3558 = vpow2.f32 %v2958_v47 }
 0xe18   :  { %v1614_v55 = vadd.f32 %v3304_v1, %v3746_v11  ;;  %v1586_v25 = vadd.f32 %v3304_v1, %v1477_v36 }
 0xe19   :  { %v1574_v56 = vpop.f32.mrf.mxu1  ;;  %3560 = vpow2.f32 %v2957_v10 }
 0xe1a   :  { %v1613_v6 = vadd.f32 %v1574_v56, %v3746_v11  ;;  %1625 = vrot.lane.b32.xlu0 %v1614_v55, %s3639_s4  ;;  %v1585_v39 = vadd.f32 %v1574_v56, %v1476_v5  ;;  %v2960_v40 = vmul.f32 -1.442695, %v1586_v25  ;;  %v53_v55 = vld [vmem:[%s4484_s0 + $0xc0] sm:$0xff]  ;;  %v54_v56 = vld [vmem:[%s4484_s0 + $0xc8] sm:$0xff] }
 0xe1b   :  { %3209 = vmatprep.mubr.msk.f32.mxu0 %vm62_vm1, %v53_v55 }
 0xe1c   :  { %1623 = vrot.lane.b32.xlu1 %v1613_v6, %s3639_s4  ;;  %v2959_v23 = vmul.f32 -1.442695, %v1585_v39  ;;  %3562 = vpow2.f32 %v2960_v40  ;;  %3210 = vmatmul.mubr.msk.f32.gmra.mxu0 %vm62_vm1, %v54_v56  ;;  %v55_v6 = vld [vmem:[%s4484_s0 + $0xd0] sm:$0xff] }
 0xe1d   :  { %3212 = vmatprep.mubr.msk.f32.mxu0 %vm62_vm1, %v55_v6 }
 0xe1e   :  { %3564 = vpow2.f32 %v2959_v23 }
 0xe20   :  { %3213 = vmatmul.mubr.msk.f32.gmra.mxu0 %vm62_vm1, %v56_v0 }
 0xe24   :  { %v3559_v14 = vpop.eup %3558 }
 0xe25   :  { %v1600_v16 = vadd.f32 1.0, %v3559_v14 }
 0xe26   :  { %v3561_v15 = vpop.eup %3560 }
 0xe27   :  { %v1599_v29 = vadd.f32 1.0, %v3561_v15  ;;  %3566 = vrcp.f32 %v1600_v16 }
 0xe29   :  { %v3563_v27 = vpop.eup %3562  ;;  %3568 = vrcp.f32 %v1599_v29 }
 0xe2a   :  { %v1602_v18 = vadd.f32 1.0, %v3563_v27 }
 0xe2b   :  { %v3565_v17 = vpop.eup %3564 }
 0xe2c   :  { %v1601_v19 = vadd.f32 1.0, %v3565_v17  ;;  %3570 = vrcp.f32 %v1602_v18 }
 0xe2e   :  { %3572 = vrcp.f32 %v1601_v19 }
 0xe34   :  { %v3567_v21 = vpop.eup %3566 }
 0xe35   :  { %v1660_v9 = vsub.f32 1.0, %v3567_v21  ;;  %v1684_v61 = vmul.f32 %v3567_v21, %v4113_v34 }
 0xe36   :  { %v3569_v31 = vpop.eup %3568 }
 0xe37   :  { %v1659_v63 = vsub.f32 1.0, %v3569_v31  ;;  %v1683_v42 = vmul.f32 %v3569_v31, %v4116_v43 }
 0xe39   :  { %v3571_v38 = vpop.eup %3570 }
 0xe3a   :  { %v1662_v47 = vsub.f32 1.0, %v3571_v38  ;;  %v1686_v39 = vmul.f32 %v3571_v38, %v4123_v2 }
 0xe3b   :  { %v3573_v45 = vpop.eup %3572 }
 0xe3c   :  { %v1661_v23 = vsub.f32 1.0, %v3573_v45  ;;  %v1685_v43 = vmul.f32 %v3573_v45, %v4126_v8 }
 0xe87   :  { %v1622_v24 = vpop.permute.xlu0 %1621 }
 0xe88   :  { %v1632_v28 = vmul.f32 %v3567_v21, %v1622_v24 }
 0xe89   :  { %v1620_v32 = vpop.permute.xlu1 %1619 }
 0xe8a   :  { %v1631_v35 = vmul.f32 %v3569_v31, %v1620_v32  ;;  %1641 = vrot.lane.b32.xlu0 %v1632_v28, %s3639_s4 }
 0xe8c   :  { %v1626_v41 = vpop.permute.xlu0 %1625  ;;  %1639 = vrot.lane.b32.xlu1 %v1631_v35, %s3639_s4 }
 0xe8d   :  { %v1634_v44 = vmul.f32 %v3571_v38, %v1626_v41 }
 0xe8e   :  { %v1624_v46 = vpop.permute.xlu1 %1623 }
 0xe8f   :  { %v1633_v60 = vmul.f32 %v3573_v45, %v1624_v46  ;;  %1645 = vrot.lane.b32.xlu0 %v1634_v44, %s3639_s4 }
 0xe91   :  { %1643 = vrot.lane.b32.xlu1 %v1633_v60, %s3639_s4 }
 0xefc   :  { %v1642_v57 = vpop.permute.xlu0 %1641 }
 0xefd   :  { %v1652_v59 = vadd.f32 %v1642_v57, %v1475_v58 }
 0xefe   :  { %v1640_v48 = vpop.permute.xlu1 %1639 }
 0xeff   :  { %3574 = vtanh.f32 %v1652_v59  ;;  %v1651_v4 = vadd.f32 %v1640_v48, %v1474_v62 }
 0xf01   :  { %3576 = vtanh.f32 %v1651_v4  ;;  %v1646_v50 = vpop.permute.xlu0 %1645 }
 0xf02   :  { %v1654_v7 = vadd.f32 %v1646_v50, %v1477_v36 }
 0xf03   :  { %v1644_v12 = vpop.permute.xlu1 %1643 }
 0xf04   :  { %3578 = vtanh.f32 %v1654_v7  ;;  %v1653_v51 = vadd.f32 %v1644_v12, %v1476_v5 }
 0xf06   :  { %3580 = vtanh.f32 %v1653_v51 }
 0xf0c   :  { %v3575_v52 = vpop.eup %3574 }
 0xf0d   :  { %1669 = vrot.lane.b32.xlu0 %v3575_v52, %s3640_s10 }
 0xf0e   :  { %v3577_v53 = vpop.eup %3576 }
 0xf0f   :  { %1667 = vrot.lane.b32.xlu1 %v3577_v53, %s3640_s10 }
 0xf11   :  { %v3579_v54 = vpop.eup %3578 }
 0xf12   :  { %1673 = vrot.lane.b32.xlu0 %v3579_v54, %s3640_s10 }
 0xf13   :  { %v3581_v1 = vpop.eup %3580 }
 0xf14   :  { %1671 = vrot.lane.b32.xlu1 %v3581_v1, %s3640_s10 }
 0xf7f   :  { %v1670_v58 = vpop.permute.xlu0 %1669 }
 0xf80   :  { %v1680_v62 = vmul.f32 %v1670_v58, %v1660_v9 }
 0xf81   :  { %v1668_v3 = vpop.permute.xlu1 %1667 }
 0xf82   :  { %v4181_v36 = vadd.f32 %v1684_v61, %v1680_v62  ;;  %v1679_v5 = vmul.f32 %v1668_v3, %v1659_v63 }
 0xf84   :  { %v4184_v25 = vadd.f32 %v1683_v42, %v1679_v5  ;;  %v1674_v10 = vpop.permute.xlu0 %1673  ;;  %1701 = vrot.lane.b32.xlu0 %v4181_v36, %s3640_s10 }
 0xf85   :  { %v1682_v40 = vmul.f32 %v1674_v10, %v1662_v47 }
 0xf86   :  { %v1672_v34 = vpop.permute.xlu1 %1671  ;;  %1699 = vrot.lane.b32.xlu1 %v4184_v25, %s3640_s10 }
 0xf87   :  { %v4191_v14 = vadd.f32 %v1686_v39, %v1682_v40  ;;  %v1681_v15 = vmul.f32 %v1672_v34, %v1661_v23 }
 0xf89   :  { %v4194_v16 = vadd.f32 %v1685_v43, %v1681_v15  ;;  %1705 = vrot.lane.b32.xlu0 %v4191_v14, %s3640_s10 }
 0xf8b   :  { %1703 = vrot.lane.b32.xlu1 %v4194_v16, %s3640_s10 }
 0xff6   :  { %v1702_v2 = vpop.permute.xlu0 %1701 }
 0xff8   :  { %v1700_v27 = vpop.permute.xlu1 %1699 }
 0xff9   :  { %3313 = vmatprep.mubr.msk.f32.mxu1 %vm401_vm2, %v1700_v27 }
 0xffa   :  { %3314 = vmatmul.mubr.msk.f32.vlgmr.msra.gmra.mxu1 %vm401_vm2, %v1702_v2 }
 0xffb   :  { %3320 = vmatpush3.msra.mxu1 %v4029_v30  ;;  %v1706_v29 = vpop.permute.xlu0 %1705 }
 0xffc   :  { %3321 = vmatprep.subr.mxu1 %v4035_v49 }
 0xffd   :  { %v1704_v8 = vpop.permute.xlu1 %1703  ;;  %3322 = vmatpush3.msra.mxu1 %v4035_v49 }
 0xffe   :  { %3316 = vmatprep.mubr.msk.f32.mxu1 %vm401_vm2, %v1704_v8  ;;  %3323 = vmatprep.subr.mxu1 %v4043_v13 }
 0xfff   :  { %3317 = vmatmul.mubr.msk.f32.gmra.mxu1 %vm401_vm2, %v1706_v29 }
0x1000   :  { %3324 = vmatpush3.msra.mxu1 %v4043_v13 }
0x1001   :  { %3325 = vmatprep.subr.mxu1 %v4051_v22 }
0x1002   :  { %3326 = vmatpush3.msra.mxu1 %v4051_v22  ;;  %v3211_v22 = vpop.f32.mrf.mxu0 }
0x1003   :  { %v1692_v31 = vadd.f32 %v4067_v20, %v3211_v22 }
0x1004   :  { %v349_v28 = vpop.f32.mrf.mxu0 }
0x1005   :  { %v1691_v35 = vadd.f32 %v4073_v26, %v349_v28 }
0x1006   :  { %v3214_v32 = vpop.f32.mrf.mxu0 }
0x1007   :  { %v1694_v44 = vadd.f32 %v4079_v33, %v3214_v32 }
0x1008   :  { %v359_v41 = vpop.f32.mrf.mxu0 }
0x1009   :  { %v1693_v46 = vadd.f32 %v4085_v37, %v359_v41 }
0x10ba   :  { %v3315_v17 = vpop.f32.mrf.mxu1 }
0x10bb   :  { %v1829_v30 = vadd.f32 %v3315_v17, %v3746_v11  ;;  %v1801_v38 = vadd.f32 %v3315_v17, %v1692_v31 }
0x10bc   :  { %v1781_v18 = vpop.f32.mrf.mxu1 }
0x10bd   :  { %v1828_v19 = vadd.f32 %v1781_v18, %v3746_v11  ;;  %1838 = vrot.lane.b32.xlu0 %v1829_v30, %s3639_s4  ;;  %v1800_v45 = vadd.f32 %v1781_v18, %v1691_v35  ;;  %v2966_v60 = vmul.f32 -1.442695, %v1801_v38  ;;  %v57_v30 = vld [vmem:[%s4484_s0 + $0xe0] sm:$0xff]  ;;  %v58_v18 = vld [vmem:[%s4484_s0 + $0xe8] sm:$0xff] }
0x10be   :  { %3215 = vmatprep.mubr.msk.f32.mxu0 %vm62_vm1, %v57_v30 }
0x10bf   :  { %v3318_v49 = vpop.f32.mrf.mxu1  ;;  %1836 = vrot.lane.b32.xlu1 %v1828_v19, %s3639_s4  ;;  %v2965_v59 = vmul.f32 -1.442695, %v1800_v45  ;;  %3582 = vpow2.f32 %v2966_v60  ;;  %3216 = vmatmul.mubr.msk.f32.gmra.mxu0 %vm62_vm1, %v58_v18  ;;  %v59_v19 = vld [vmem:[%s4484_s0 + $0xf0] sm:$0xff] }
0x10c0   :  { %v1831_v21 = vadd.f32 %v3318_v49, %v3746_v11  ;;  %v1803_v57 = vadd.f32 %v3318_v49, %v1694_v44  ;;  %v60_v49 = vld [vmem:[%s4484_s0 + $0xf8] sm:$0xff]  ;;  %3218 = vmatprep.mubr.msk.f32.mxu0 %vm62_vm1, %v59_v19 }
0x10c1   :  { %v1791_v24 = vpop.f32.mrf.mxu1  ;;  %3584 = vpow2.f32 %v2965_v59 }
0x10c2   :  { %v1830_v13 = vadd.f32 %v1791_v24, %v3746_v11  ;;  %1842 = vrot.lane.b32.xlu0 %v1831_v21, %s3639_s4  ;;  %v1802_v48 = vadd.f32 %v1791_v24, %v1693_v46  ;;  %v2968_v4 = vmul.f32 -1.442695, %v1803_v57 }
0x10c3   :  { %3219 = vmatmul.mubr.msk.f32.gmra.mxu0 %vm62_vm1, %v60_v49 }
0x10c4   :  { %1840 = vrot.lane.b32.xlu1 %v1830_v13, %s3639_s4  ;;  %v2967_v50 = vmul.f32 -1.442695, %v1802_v48  ;;  %3586 = vpow2.f32 %v2968_v4 }
0x10c6   :  { %3588 = vpow2.f32 %v2967_v50 }
0x10cc   :  { %v3583_v7 = vpop.eup %3582 }
0x10cd   :  { %v1817_v51 = vadd.f32 1.0, %v3583_v7 }
0x10ce   :  { %v3585_v12 = vpop.eup %3584 }
0x10cf   :  { %v1816_v53 = vadd.f32 1.0, %v3585_v12  ;;  %3590 = vrcp.f32 %v1817_v51 }
0x10d1   :  { %v3587_v52 = vpop.eup %3586  ;;  %3592 = vrcp.f32 %v1816_v53 }
0x10d2   :  { %v1819_v1 = vadd.f32 1.0, %v3587_v52 }
0x10d3   :  { %v3589_v54 = vpop.eup %3588 }
0x10d4   :  { %v1818_v55 = vadd.f32 1.0, %v3589_v54  ;;  %3594 = vrcp.f32 %v1819_v1 }
0x10d6   :  { %3596 = vrcp.f32 %v1818_v55 }
0x10dc   :  { %v3591_v56 = vpop.eup %3590 }
0x10dd   :  { %v1877_v21 = vsub.f32 1.0, %v3591_v56  ;;  %v1901_v13 = vmul.f32 %v3591_v56, %v4181_v36 }
0x10de   :  { %v3593_v9 = vpop.eup %3592 }
0x10df   :  { %v1876_v28 = vsub.f32 1.0, %v3593_v9 }
0x10e1   :  { %v3595_v62 = vpop.eup %3594 }
0x10e2   :  { %v1879_v41 = vsub.f32 1.0, %v3595_v62 }
0x10e3   :  { %v3597_v42 = vpop.eup %3596 }
0x10e4   :  { %v1878_v57 = vsub.f32 1.0, %v3597_v42 }
0x112f   :  { %v1839_v6 = vpop.permute.xlu0 %1838 }
0x1130   :  { %v1849_v0 = vmul.f32 %v3591_v56, %v1839_v6 }
0x1131   :  { %v1837_v58 = vpop.permute.xlu1 %1836 }
0x1132   :  { %v1848_v61 = vmul.f32 %v3593_v9, %v1837_v58  ;;  %1858 = vrot.lane.b32.xlu0 %v1849_v0, %s3639_s4 }
0x1134   :  { %v1843_v63 = vpop.permute.xlu0 %1842  ;;  %1856 = vrot.lane.b32.xlu1 %v1848_v61, %s3639_s4 }
0x1135   :  { %v1851_v3 = vmul.f32 %v3595_v62, %v1843_v63 }
0x1136   :  { %v1841_v5 = vpop.permute.xlu1 %1840 }
0x1137   :  { %v1850_v47 = vmul.f32 %v3597_v42, %v1841_v5  ;;  %1862 = vrot.lane.b32.xlu0 %v1851_v3, %s3639_s4 }
0x1139   :  { %1860 = vrot.lane.b32.xlu1 %v1850_v47, %s3639_s4 }
0x117f   :  { %v3217_v6 = vpop.f32.mrf.mxu0 }
0x1180   :  { %v1909_v63 = vadd.f32 %v4067_v20, %v3217_v6 }
0x1181   :  { %v369_v0 = vpop.f32.mrf.mxu0 }
0x11a4   :  { %v1859_v10 = vpop.permute.xlu0 %1858 }
0x11a5   :  { %v1869_v39 = vadd.f32 %v1859_v10, %v1692_v31 }
0x11a6   :  { %v1857_v40 = vpop.permute.xlu1 %1856 }
0x11a7   :  { %3598 = vtanh.f32 %v1869_v39  ;;  %v1868_v23 = vadd.f32 %v1857_v40, %v1691_v35  ;;  %v1900_v35 = vmul.f32 %v3593_v9, %v4184_v25  ;;  %v1902_v25 = vmul.f32 %v3597_v42, %v4194_v16  ;;  %v3220_v9 = vpop.f32.mrf.mxu0 }
0x11a8   :  { %v1911_v61 = vadd.f32 %v4079_v33, %v3220_v9  ;;  %v1908_v42 = vadd.f32 %v4073_v26, %v369_v0 }
0x11a9   :  { %3600 = vtanh.f32 %v1868_v23  ;;  %v1863_v34 = vpop.permute.xlu0 %1862  ;;  %v379_v58 = vpop.f32.mrf.mxu0 }
0x11aa   :  { %v1871_v43 = vadd.f32 %v1863_v34, %v1694_v44 }
0x11ab   :  { %v1861_v15 = vpop.permute.xlu1 %1860 }
0x11ac   :  { %3602 = vtanh.f32 %v1871_v43  ;;  %v1870_v2 = vadd.f32 %v1861_v15, %v1693_v46  ;;  %v1903_v46 = vmul.f32 %v3595_v62, %v4191_v14  ;;  %v1910_v62 = vadd.f32 %v4085_v37, %v379_v58 }
0x11ae   :  { %3604 = vtanh.f32 %v1870_v2 }
0x11b4   :  { %v3599_v27 = vpop.eup %3598 }
0x11b5   :  { %1886 = vrot.lane.b32.xlu0 %v3599_v27, %s3640_s10 }
0x11b6   :  { %v3601_v8 = vpop.eup %3600 }
0x11b7   :  { %1884 = vrot.lane.b32.xlu1 %v3601_v8, %s3640_s10 }
0x11b9   :  { %v3603_v29 = vpop.eup %3602 }
0x11ba   :  { %1890 = vrot.lane.b32.xlu0 %v3603_v29, %s3640_s10 }
0x11bb   :  { %v3605_v17 = vpop.eup %3604 }
0x11bc   :  { %1888 = vrot.lane.b32.xlu1 %v3605_v17, %s3640_s10 }
0x1227   :  { %v1887_v24 = vpop.permute.xlu0 %1886 }
0x1228   :  { %v1897_v22 = vmul.f32 %v1887_v24, %v1877_v21 }
0x1229   :  { %v1885_v31 = vpop.permute.xlu1 %1884 }
0x122a   :  { %v4248_v32 = vadd.f32 %v1901_v13, %v1897_v22  ;;  %v1896_v38 = vmul.f32 %v1885_v31, %v1876_v28 }
0x122c   :  { %v4251_v44 = vadd.f32 %v1900_v35, %v1896_v38  ;;  %v1891_v45 = vpop.permute.xlu0 %1890  ;;  %1918 = vrot.lane.b32.xlu0 %v4248_v32, %s3640_s10 }
0x122d   :  { %v1899_v60 = vmul.f32 %v1891_v45, %v1879_v41 }
0x122e   :  { %v1889_v36 = vpop.permute.xlu1 %1888  ;;  %1916 = vrot.lane.b32.xlu1 %v4251_v44, %s3640_s10 }
0x122f   :  { %v4258_v59 = vadd.f32 %v1903_v46, %v1899_v60  ;;  %v1898_v48 = vmul.f32 %v1889_v36, %v1878_v57 }
0x1231   :  { %v4261_v4 = vadd.f32 %v1902_v25, %v1898_v48  ;;  %1922 = vrot.lane.b32.xlu0 %v4258_v59, %s3640_s10 }
0x1233   :  { %1920 = vrot.lane.b32.xlu1 %v4261_v4, %s3640_s10 }
0x129e   :  { %v1919_v14 = vpop.permute.xlu0 %1918 }
0x12a0   :  { %v1917_v50 = vpop.permute.xlu1 %1916 }
0x12a1   :  { %3327 = vmatprep.mubr.msk.f32.mxu1 %vm401_vm2, %v1917_v50 }
0x12a2   :  { %3328 = vmatmul.mubr.msk.f32.vlgmr.msra.gmra.mxu1 %vm401_vm2, %v1919_v14  ;;  %v2125_v14 = vld [vmem:[%s4487_s5] sm:$0xff] }
0x12a3   :  { %v1923_v12 = vpop.permute.xlu0 %1922  ;;  %3341 = vmatprep.mubr.msk.f32.mxu0 %vm401_vm2, %v2125_v14 }
0x12a5   :  { %v1921_v7 = vpop.permute.xlu1 %1920 }
0x12a6   :  { %3330 = vmatprep.mubr.msk.f32.mxu1 %vm401_vm2, %v1921_v7 }
0x12a7   :  { %3331 = vmatmul.mubr.msk.f32.gmra.mxu1 %vm401_vm2, %v1923_v12 }
0x1362   :  { %v3329_v16 = vpop.f32.mrf.mxu1 }
0x1363   :  { %v2046_v55 = vadd.f32 %v3329_v16, %v3746_v11  ;;  %v2018_v47 = vadd.f32 %v3329_v16, %v1909_v63 }
0x1364   :  { %v1998_v51 = vpop.f32.mrf.mxu1 }
0x1365   :  { %v2045_v56 = vadd.f32 %v1998_v51, %v3746_v11  ;;  %v2017_v10 = vadd.f32 %v1998_v51, %v1908_v42  ;;  %v2974_v40 = vmul.f32 -1.442695, %v2018_v47 }
0x1367   :  { %v3332_v52 = vpop.f32.mrf.mxu1  ;;  %v2973_v23 = vmul.f32 -1.442695, %v2017_v10  ;;  %v2127_v10 = vld [vmem:[%s4487_s5 + $0x10] sm:$0xff] }
0x1368   :  { %v2048_v53 = vadd.f32 %v3332_v52, %v3746_v11  ;;  %v2020_v3 = vadd.f32 %v3332_v52, %v1911_v61 }
0x1369   :  { %v2008_v54 = vpop.f32.mrf.mxu1 }
0x136a   :  { %v2047_v1 = vadd.f32 %v2008_v54, %v3746_v11  ;;  %2059 = vrot.lane.b32.xlu1 %v2048_v53, %s3639_s4  ;;  %v2019_v5 = vadd.f32 %v2008_v54, %v1910_v62  ;;  %v2976_v11 = vmul.f32 -1.442695, %v2020_v3 }
0x136c   :  { %2057 = vrot.lane.b32.xlu0 %v2047_v1, %s3639_s4  ;;  %v2975_v39 = vmul.f32 -1.442695, %v2019_v5  ;;  %3606 = vpow2.f32 %v2976_v11  ;;  %v2126_v11 = vld [vmem:[%s4487_s5 + $0x8] sm:$0xff] }
0x136e   :  { %2055 = vrot.lane.b32.xlu1 %v2046_v55, %s3639_s4  ;;  %3608 = vpow2.f32 %v2975_v39  ;;  %v2128_v39 = vld [vmem:[%s4487_s5 + $0x18] sm:$0xff] }
0x136f   :  { %3610 = vpow2.f32 %v2974_v40  ;;  %v2129_v40 = vld [vmem:[%s4487_s5 + $0x20] sm:$0xff] }
0x1370   :  { %2053 = vrot.lane.b32.xlu0 %v2045_v56, %s3639_s4  ;;  %3612 = vpow2.f32 %v2973_v23  ;;  %v2130_v23 = vld [vmem:[%s4487_s5 + $0x28] sm:$0xff] }
0x1379   :  { %v3607_v34 = vpop.eup %3606 }
0x137a   :  { %v2036_v43 = vadd.f32 1.0, %v3607_v34  ;;  %v2131_v34 = vld [vmem:[%s4487_s5 + $0x30] sm:$0xff] }
0x137b   :  { %v3609_v33 = vpop.eup %3608 }
0x137c   :  { %v3611_v37 = vpop.eup %3610  ;;  %v2035_v15 = vadd.f32 1.0, %v3609_v33  ;;  %3614 = vrcp.f32 %v2036_v43  ;;  %v2132_v33 = vld [vmem:[%s4487_s5 + $0x38] sm:$0xff]  ;;  %v2133_v43 = vld [vmem:[%s4487_s5 + $0x40] sm:$0xff] }
0x137d   :  { %v3613_v20 = vpop.eup %3612  ;;  %v2034_v2 = vadd.f32 1.0, %v3611_v37  ;;  %v2134_v37 = vld [vmem:[%s4487_s5 + $0x48] sm:$0xff] }
0x137e   :  { %v2033_v26 = vadd.f32 1.0, %v3613_v20  ;;  %3616 = vrcp.f32 %v2035_v15  ;;  %v2135_v15 = vld [vmem:[%s4487_s5 + $0x50] sm:$0xff]  ;;  %v2136_v20 = vld [vmem:[%s4487_s5 + $0x58] sm:$0xff] }
0x137f   :  { %3618 = vrcp.f32 %v2034_v2  ;;  %v2137_v2 = vld [vmem:[%s4487_s5 + $0x60] sm:$0xff] }
0x1380   :  { %3620 = vrcp.f32 %v2033_v26  ;;  %v2138_v26 = vld [vmem:[%s4487_s5 + $0x68] sm:$0xff] }
0x1389   :  { %v3615_v27 = vpop.eup %3614 }
0x138a   :  { %v2096_v50 = vsub.f32 1.0, %v3615_v27  ;;  %v2120_v12 = vmul.f32 %v3615_v27, %v4258_v59 }
0x138b   :  { %v3617_v17 = vpop.eup %3616 }
0x138c   :  { %v3619_v19 = vpop.eup %3618  ;;  %v2095_v51 = vsub.f32 1.0, %v3617_v17  ;;  %v2119_v54 = vmul.f32 %v3617_v17, %v4261_v4  ;;  %v2356_v4 = vld [vmem:[%s4488_s6 + $0x30] sm:$0xff] }
0x138d   :  { %v3621_v24 = vpop.eup %3620  ;;  %v2094_v55 = vsub.f32 1.0, %v3619_v19  ;;  %v2118_v0 = vmul.f32 %v3619_v19, %v4248_v32  ;;  %v2357_v32 = vld [vmem:[%s4488_s6 + $0x38] sm:$0xff] }
0x138e   :  { %v2093_v58 = vsub.f32 1.0, %v3621_v24  ;;  %v2117_v59 = vmul.f32 %v3621_v24, %v4251_v44  ;;  %3365 = vmatprep.subr.mxu1 %v2357_v32 }
0x138f   :  { %3366 = vmatpush3.msra.mxu1 %v2357_v32 }
0x1390   :  { %3367 = vmatprep.subr.mxu1 %v2356_v4 }
0x1391   :  { %3368 = vmatpush3.msra.mxu1 %v2356_v4 }
0x13dc   :  { %v2060_v8 = vpop.permute.xlu1 %2059 }
0x13dd   :  { %v2068_v29 = vmul.f32 %v3615_v27, %v2060_v8  ;;  %v2139_v27 = vld [vmem:[%s4487_s5 + $0x70] sm:$0xff]  ;;  %v2140_v8 = vld [vmem:[%s4487_s5 + $0x78] sm:$0xff] }
0x13de   :  { %v2058_v30 = vpop.permute.xlu0 %2057 }
0x13df   :  { %v2067_v18 = vmul.f32 %v3617_v17, %v2058_v30  ;;  %2079 = vrot.lane.b32.xlu1 %v2068_v29, %s3639_s4  ;;  %v2355_v29 = vld [vmem:[%s4488_s6 + $0x28] sm:$0xff]  ;;  %v2354_v17 = vld [vmem:[%s4488_s6 + $0x20] sm:$0xff]  ;;  %v2353_v30 = vld [vmem:[%s4488_s6 + $0x18] sm:$0xff] }
0x13e0   :  { %v2056_v49 = vpop.permute.xlu1 %2055  ;;  %3369 = vmatprep.subr.mxu1 %v2355_v29 }
0x13e1   :  { %v2066_v21 = vmul.f32 %v3619_v19, %v2056_v49  ;;  %2077 = vrot.lane.b32.xlu0 %v2067_v18, %s3639_s4  ;;  %3370 = vmatpush3.msra.mxu1 %v2355_v29  ;;  %v2369_v18 = vld [vmem:[%s4488_s6 + $0x98] sm:$0xff]  ;;  %v2368_v19 = vld [vmem:[%s4488_s6 + $0x90] sm:$0xff]  ;;  %v2367_v49 = vld [vmem:[%s4488_s6 + $0x88] sm:$0xff] }
0x13e2   :  { %v2054_v13 = vpop.permute.xlu0 %2053  ;;  %3371 = vmatprep.subr.mxu1 %v2354_v17 }
0x13e3   :  { %v2065_v22 = vmul.f32 %v3621_v24, %v2054_v13  ;;  %2075 = vrot.lane.b32.xlu1 %v2066_v21, %s3639_s4  ;;  %3372 = vmatpush3.msra.mxu1 %v2354_v17  ;;  %v2366_v21 = vld [vmem:[%s4488_s6 + $0x80] sm:$0xff] }
0x13e4   :  { %3379 = vmatprep.subr.mxu1 %v2353_v30 }
0x13e5   :  { %2073 = vrot.lane.b32.xlu0 %v2065_v22, %s3639_s4  ;;  %v2352_v22 = vld [vmem:[%s4488_s6 + $0x10] sm:$0xff] }
0x1451   :  { %v2080_v28 = vpop.permute.xlu1 %2079 }
0x1452   :  { %v2088_v31 = vadd.f32 %v2080_v28, %v1911_v61 }
0x1453   :  { %v2078_v35 = vpop.permute.xlu0 %2077 }
0x1454   :  { %3622 = vtanh.f32 %v2088_v31  ;;  %v2087_v38 = vadd.f32 %v2078_v35, %v1910_v62  ;;  %v2351_v31 = vld [vmem:[%s4488_s6 + $0x8] sm:$0xff] }
0x1455   :  { %v2076_v41 = vpop.permute.xlu1 %2075 }
0x1456   :  { %3624 = vtanh.f32 %v2087_v38  ;;  %v2086_v45 = vadd.f32 %v2076_v41, %v1909_v63  ;;  %v2350_v38 = vld [vmem:[%s4488_s6] sm:$0xff] }
0x1457   :  { %v2074_v46 = vpop.permute.xlu0 %2073 }
0x1458   :  { %3626 = vtanh.f32 %v2086_v45  ;;  %v2085_v60 = vadd.f32 %v2074_v46, %v1908_v42  ;;  %v2361_v45 = vld [vmem:[%s4488_s6 + $0x58] sm:$0xff] }
0x145a   :  { %3628 = vtanh.f32 %v2085_v60  ;;  %v2360_v60 = vld [vmem:[%s4488_s6 + $0x50] sm:$0xff] }
0x1461   :  { %v3623_v57 = vpop.eup %3622 }
0x1462   :  { %2107 = vrot.lane.b32.xlu1 %v3623_v57, %s3640_s10 }
0x1463   :  { %v3625_v36 = vpop.eup %3624 }
0x1464   :  { %2105 = vrot.lane.b32.xlu0 %v3625_v36, %s3640_s10  ;;  %v2359_v36 = vld [vmem:[%s4488_s6 + $0x48] sm:$0xff] }
0x1465   :  { %v3627_v25 = vpop.eup %3626 }
0x1466   :  { %2103 = vrot.lane.b32.xlu1 %v3627_v25, %s3640_s10 }
0x1467   :  { %v3629_v48 = vpop.eup %3628 }
0x1468   :  { %2101 = vrot.lane.b32.xlu0 %v3629_v48, %s3640_s10  ;;  %v2358_v48 = vld [vmem:[%s4488_s6 + $0x40] sm:$0xff] }
0x14d4   :  { %v2108_v7 = vpop.permute.xlu1 %2107 }
0x14d5   :  { %v2116_v16 = vmul.f32 %v2108_v7, %v2096_v50  ;;  %v2365_v50 = vld [vmem:[%s4488_s6 + $0x78] sm:$0xff] }
0x14d6   :  { %v2106_v52 = vpop.permute.xlu0 %2105 }
0x14d7   :  { %v2124_v53 = vadd.f32 %v2120_v12, %v2116_v16  ;;  %v2115_v1 = vmul.f32 %v2106_v52, %v2095_v51  ;;  %v2364_v12 = vld [vmem:[%s4488_s6 + $0x70] sm:$0xff]  ;;  %v2363_v51 = vld [vmem:[%s4488_s6 + $0x68] sm:$0xff] }
0x14d8   :  { %v2104_v56 = vpop.permute.xlu1 %2103 }
0x14d9   :  { %v2123_v6 = vadd.f32 %v2119_v54, %v2115_v1  ;;  %v2114_v9 = vmul.f32 %v2104_v56, %v2094_v55  ;;  %2151 = vrot.lane.b32.xlu1 %v2124_v53, %s3640_s10  ;;  %v2362_v53 = vld [vmem:[%s4488_s6 + $0x60] sm:$0xff] }
0x14da   :  { %v2102_v61 = vpop.permute.xlu0 %2101 }
0x14db   :  { %v2122_v62 = vadd.f32 %v2118_v0, %v2114_v9  ;;  %v2113_v63 = vmul.f32 %v2102_v61, %v2093_v58  ;;  %2149 = vrot.lane.b32.xlu0 %v2123_v6, %s3640_s10 }
0x14dd   :  { %v2121_v3 = vadd.f32 %v2117_v59, %v2113_v63  ;;  %2147 = vrot.lane.b32.xlu1 %v2122_v62, %s3640_s10 }
0x14df   :  { %2145 = vrot.lane.b32.xlu0 %v2121_v3, %s3640_s10 }
0x154b   :  { %v4309_v44 = vpop.permute.xlu1 %2151 }
0x154c   :  { %3333 = vmatprep.subr.mxu0 %v4309_v44 }
0x154d   :  { %3334 = vmatpush3.msra.mxu0 %v4309_v44  ;;  %v4313_v42 = vpop.permute.xlu0 %2149 }
0x154e   :  { %3335 = vmatprep.subr.mxu0 %v4313_v42 }
0x154f   :  { %v4316_v5 = vpop.permute.xlu1 %2147  ;;  %3336 = vmatpush3.msra.mxu0 %v4313_v42 }
0x1550   :  { %3337 = vmatprep.subr.mxu0 %v4316_v5 }
0x1551   :  { %3338 = vmatpush3.msra.mxu0 %v4316_v5  ;;  %v4321_v47 = vpop.permute.xlu0 %2145 }
0x1552   :  { %3339 = vmatprep.subr.mxu0 %v4321_v47 }
0x1553   :  { %3340 = vmatpush3.msra.mxu0 %v4321_v47 }
0x1554   :  { %3342 = vmatmul.mubr.msk.f32.vlgmr.msra.gmra.mxu0 %vm401_vm2, %v2126_v11  ;;  %3421 = vmatprep.subr.mxu0 %v2369_v18 }
0x1555   :  { %3344 = vmatprep.mubr.msk.f32.mxu0 %vm401_vm2, %v2127_v10  ;;  %3422 = vmatpush3.msra.mxu0 %v2369_v18 }
0x1556   :  { %3423 = vmatprep.subr.mxu0 %v2368_v19 }
0x1557   :  { %3424 = vmatpush3.msra.mxu0 %v2368_v19 }
0x1558   :  { %3345 = vmatmul.mubr.msk.f32.gmra.mxu0 %vm401_vm2, %v2128_v39  ;;  %3425 = vmatprep.subr.mxu0 %v2367_v49 }
0x1559   :  { %3347 = vmatprep.mubr.msk.f32.mxu0 %vm401_vm2, %v2129_v40  ;;  %3426 = vmatpush3.msra.mxu0 %v2367_v49 }
0x155a   :  { %3427 = vmatprep.subr.mxu0 %v2366_v21 }
0x155b   :  { %3428 = vmatpush3.msra.mxu0 %v2366_v21 }
0x155c   :  { %3348 = vmatmul.mubr.msk.f32.gmra.mxu0 %vm401_vm2, %v2130_v23 }
0x155d   :  { %3350 = vmatprep.mubr.msk.f32.mxu0 %vm401_vm2, %v2131_v34 }
0x1560   :  { %3351 = vmatmul.mubr.msk.f32.gmra.mxu0 %vm401_vm2, %v2132_v33  ;;  %v3013_v33 = vld [vmem:[%s4489_s7] ss:$0 sm:$0xff] }
0x1561   :  { %3353 = vmatprep.mubr.msk.f32.mxu0 %vm401_vm2, %v2133_v43 }
0x1564   :  { %3354 = vmatmul.mubr.msk.f32.gmra.mxu0 %vm401_vm2, %v2134_v37 }
0x1565   :  { %3356 = vmatprep.mubr.msk.f32.mxu0 %vm401_vm2, %v2135_v15 }
0x1568   :  { %3357 = vmatmul.mubr.msk.f32.gmra.mxu0 %vm401_vm2, %v2136_v20 }
0x1569   :  { %3359 = vmatprep.mubr.msk.f32.mxu0 %vm401_vm2, %v2137_v2 }
0x156c   :  { %3360 = vmatmul.mubr.msk.f32.gmra.mxu0 %vm401_vm2, %v2138_v26 }
0x156d   :  { %3362 = vmatprep.mubr.msk.f32.mxu0 %vm401_vm2, %v2139_v27 }
0x1570   :  { %3363 = vmatmul.mubr.msk.f32.gmra.mxu0 %vm401_vm2, %v2140_v8 }
0x1614   :  { %v3343_v24 = vpop.f32.mrf.mxu0 }
0x1616   :  { %v2271_v13 = vpop.f32.mrf.mxu0 }
0x1617   :  { %3373 = vmatprep.mubr.msk.f32.mxu1 %vm401_vm2, %v2271_v13 }
0x1618   :  { %v3346_v28 = vpop.f32.mrf.mxu0  ;;  %3374 = vmatmul.mubr.msk.f32.vlgmr.msra.gmra.mxu1 %vm401_vm2, %v3343_v24 }
0x1619   :  { %3380 = vmatpush3.msra.mxu1 %v2353_v30 }
0x161a   :  { %v2281_v35 = vpop.f32.mrf.mxu0  ;;  %3381 = vmatprep.subr.mxu1 %v2352_v22 }
0x161b   :  { %3376 = vmatprep.mubr.msk.f32.mxu1 %vm401_vm2, %v2281_v35  ;;  %3382 = vmatpush3.msra.mxu1 %v2352_v22 }
0x161c   :  { %3377 = vmatmul.mubr.msk.f32.gmra.mxu1 %vm401_vm2, %v3346_v28  ;;  %3383 = vmatprep.subr.mxu1 %v2351_v31  ;;  %v3349_v41 = vpop.f32.mrf.mxu0 }
0x161d   :  { %3384 = vmatpush3.msra.mxu1 %v2351_v31  ;;  %3387 = vmatprep.mubr.msk.f32.mxu1 %vm401_vm2, %v4321_v47 }
0x161e   :  { %3385 = vmatprep.subr.mxu1 %v2350_v38  ;;  %v2291_v46 = vpop.f32.mrf.mxu0 }
0x161f   :  { %3386 = vmatpush3.msra.mxu1 %v2350_v38 }
0x1620   :  { %3388 = vmatmul.mubr.msk.f32.vlgmr.msra.gmra.mxu1 %vm401_vm2, %v4316_v5  ;;  %3393 = vmatprep.subr.mxu1 %v2361_v45  ;;  %v3352_v57 = vpop.f32.mrf.mxu0 }
0x1621   :  { %3390 = vmatprep.mubr.msk.f32.mxu1 %vm401_vm2, %v4313_v42  ;;  %3394 = vmatpush3.msra.mxu1 %v2361_v45 }
0x1622   :  { %3395 = vmatprep.subr.mxu1 %v2360_v60  ;;  %v2301_v25 = vpop.f32.mrf.mxu0 }
0x1623   :  { %3396 = vmatpush3.msra.mxu1 %v2360_v60 }
0x1624   :  { %3391 = vmatmul.mubr.msk.f32.gmra.mxu1 %vm401_vm2, %v4309_v44  ;;  %3397 = vmatprep.subr.mxu1 %v2359_v36  ;;  %v3355_v14 = vpop.f32.mrf.mxu0 }
0x1625   :  { %3398 = vmatpush3.msra.mxu1 %v2359_v36  ;;  %3401 = vmatprep.mubr.msk.f32.mxu1 %vm401_vm2, %v2291_v46 }
0x1626   :  { %3399 = vmatprep.subr.mxu1 %v2358_v48  ;;  %v2311_v7 = vpop.f32.mrf.mxu0 }
0x1627   :  { %3400 = vmatpush3.msra.mxu1 %v2358_v48 }
0x1628   :  { %3402 = vmatmul.mubr.msk.f32.vlgmr.msra.gmra.mxu1 %vm401_vm2, %v3349_v41  ;;  %3407 = vmatprep.subr.mxu1 %v2365_v50  ;;  %v3358_v16 = vpop.f32.mrf.mxu0 }
0x1629   :  { %3408 = vmatpush3.msra.mxu1 %v2365_v50  ;;  %3404 = vmatprep.mubr.msk.f32.mxu1 %vm401_vm2, %v2301_v25 }
0x162a   :  { %3409 = vmatprep.subr.mxu1 %v2364_v12  ;;  %v2321_v52 = vpop.f32.mrf.mxu0 }
0x162b   :  { %3410 = vmatpush3.msra.mxu1 %v2364_v12 }
0x162c   :  { %3405 = vmatmul.mubr.msk.f32.gmra.mxu1 %vm401_vm2, %v3352_v57  ;;  %3411 = vmatprep.subr.mxu1 %v2363_v51  ;;  %v3361_v54 = vpop.f32.mrf.mxu0 }
0x162d   :  { %3412 = vmatpush3.msra.mxu1 %v2363_v51  ;;  %3415 = vmatprep.mubr.msk.f32.mxu1 %vm401_vm2, %v2311_v7 }
0x162e   :  { %3413 = vmatprep.subr.mxu1 %v2362_v53  ;;  %v2331_v1 = vpop.f32.mrf.mxu0 }
0x162f   :  { %3414 = vmatpush3.msra.mxu1 %v2362_v53  ;;  %3429 = vmatprep.mubr.msk.f32.mxu0 %vm401_vm2, %v2331_v1 }
0x1630   :  { %3416 = vmatmul.mubr.msk.f32.vlgmr.msra.gmra.mxu1 %vm401_vm2, %v3355_v14  ;;  %v3364_v55 = vpop.f32.mrf.mxu0  ;;  %3430 = vmatmul.mubr.msk.f32.vlgmr.msra.gmra.mxu0 %vm401_vm2, %v3361_v54 }
0x1631   :  { %3418 = vmatprep.mubr.msk.f32.mxu1 %vm401_vm2, %v2321_v52 }
0x1632   :  { %v2341_v56 = vpop.f32.mrf.mxu0 }
0x1633   :  { %3432 = vmatprep.mubr.msk.f32.mxu0 %vm401_vm2, %v2341_v56 }
0x1634   :  { %3419 = vmatmul.mubr.msk.f32.gmra.mxu1 %vm401_vm2, %v3358_v16  ;;  %3433 = vmatmul.mubr.msk.f32.gmra.mxu0 %vm401_vm2, %v3364_v55 }
0x16d8   :  { %v3375_v6 = vpop.f32.mrf.mxu1 }
0x16da   :  { %v2448_v0 = vpop.f32.mrf.mxu1 }
0x16dc   :  { %v3378_v9 = vpop.f32.mrf.mxu1 }
0x16de   :  { %v2458_v58 = vpop.f32.mrf.mxu1 }
0x16e0   :  { %v3389_v61 = vpop.f32.mrf.mxu1 }
0x16e1   :  { %v2547_v44 = vadd.f32 %v3389_v61, %v3375_v6 }
0x16e2   :  { %v2541_v62 = vpop.f32.mrf.mxu1 }
0x16e3   :  { %v2542_v5 = vadd.f32 %v2541_v62, %v2448_v0 }
0x16e4   :  { %v3392_v59 = vpop.f32.mrf.mxu1 }
0x16e5   :  { %v2557_v39 = vadd.f32 %v3392_v59, %v3378_v9 }
0x16e6   :  { %v2551_v63 = vpop.f32.mrf.mxu1 }
0x16e7   :  { %v2552_v37 = vadd.f32 %v2551_v63, %v2458_v58 }
0x16e8   :  { %v3403_v3 = vpop.f32.mrf.mxu1 }
0x16e9   :  { %v2658_v47 = vadd.f32 %v3403_v3, %v2547_v44 }
0x16ea   :  { %v2638_v32 = vpop.f32.mrf.mxu1 }
0x16eb   :  { %v2657_v40 = vadd.f32 %v2638_v32, %v2542_v5 }
0x16ec   :  { %v3406_v4 = vpop.f32.mrf.mxu1 }
0x16ed   :  { %v2660_v15 = vadd.f32 %v3406_v4, %v2557_v39 }
0x16ee   :  { %v2648_v42 = vpop.f32.mrf.mxu1 }
0x16ef   :  { %v2659_v8 = vadd.f32 %v2648_v42, %v2552_v37 }
0x16f0   :  { %v3417_v11 = vpop.f32.mrf.mxu1  ;;  %v3431_v10 = vpop.f32.mrf.mxu0 }
0x16f1   :  { %v2759_v23 = vadd.f32 %v3417_v11, %v2658_v47 }
0x16f2   :  { %v2739_v34 = vpop.f32.mrf.mxu1  ;;  %v2840_v43 = vpop.f32.mrf.mxu0 }
0x16f3   :  { %v2758_v20 = vadd.f32 %v2739_v34, %v2657_v40  ;;  %v2860_v2 = vadd.f32 %v3431_v10, %v2759_v23 }
0x16f4   :  { %v3420_v26 = vpop.f32.mrf.mxu1  ;;  %v3434_v27 = vpop.f32.mrf.mxu0 }
0x16f5   :  { %v2871_v29 = vadd.f32 %v3013_v33, %v2860_v2  ;;  %v2761_v17 = vadd.f32 %v3420_v26, %v2660_v15  ;;  %v2859_v30 = vadd.f32 %v2840_v43, %v2758_v20 }
0x16f6   :  { %v2749_v18 = vpop.f32.mrf.mxu1  ;;  %v2850_v24 = vpop.f32.mrf.mxu0 }
0x16f7   :  { %2876 = vst.msk [vmem:[%s4490_s8 + $0x8] sm:$0xff] %vm2874_vm3, %v2871_v29  ;;  %v2870_v19 = vadd.f32 %v3013_v33, %v2859_v30  ;;  %v2760_v49 = vadd.f32 %v2749_v18, %v2659_v8  ;;  %v2862_v21 = vadd.f32 %v3434_v27, %v2761_v17 }
0x16f9   :  { %2875 = vst.msk [vmem:[%s4490_s8] sm:$0xff] %vm2874_vm3, %v2870_v19  ;;  %v2873_v13 = vadd.f32 %v3013_v33, %v2862_v21  ;;  %v2861_v22 = vadd.f32 %v2850_v24, %v2760_v49 }
0x16fb   :  { %2878 = vst.msk [vmem:[%s4490_s8 + $0x18] sm:$0xff] %vm2874_vm3, %v2873_v13  ;;  %v2872_v28 = vadd.f32 %v3013_v33, %v2861_v22 }
0x16fd   :  { %2877 = vst.msk [vmem:[%s4490_s8 + $0x10] sm:$0xff] %vm2874_vm3, %v2872_v28 }

</bundles_post_ra>
